<compile_context>
chip_gen: v6e
topology: v6e:2x2x1
jax: 0.10.0
libtpu: 0.0.40
codegen_flags: <defaults>
</compile_context>

<pallas_src>
import functools

import jax
import jax.numpy as jnp
from jax.experimental import pallas as pl
from jax.experimental.pallas import tpu as pltpu

BN_EPS = 1e-5


def _conv_bn_stats_kernel(x_ref, w_ref, y_ref, s_ref, q_ref, *, Cin, Cout, H, W, TR):
    """Direct 3x3 'same' conv on one (sample, row-tile) + per-tile BN partial sums.

    x_ref : (1, Cin, H, W) VMEM  (whole image, constant across the row-tile axis)
    w_ref : (Cout*Cin*9 + Cout,) SMEM  (flattened conv weights then bias)
    y_ref : (1, Cout, TR, W) VMEM  (conv output tile, valid region only)
    s_ref : (1, 1, Cout, 1) VMEM   per-tile sum(y)
    q_ref : (1, 1, Cout, 1) VMEM   per-tile sum(y*y)
    """
    r = pl.program_id(1)
    row0 = pl.multiple_of(r * TR, TR)

    # border masks for the halo rows (zero padding of the original image)
    tmask = (r > 0).astype(jnp.float32)
    bmask = (row0 + TR < H).astype(jnp.float32)
    top_start = jnp.maximum(row0 - 1, 0)
    bot_start = jnp.minimum(row0 + TR, H - 1)

    def widx(co, ci, dy, dx):          # row-major index into the flat weight vec
        return ((co * Cin + ci) * 3 + dy) * 3 + dx

    accs = [jnp.zeros((TR, W), jnp.float32) for _ in range(Cout)]
    zcol = jnp.zeros((TR + 2, 1), jnp.float32)

    for ci in range(Cin):
        # (TR+2, W) halo slab for this input channel (rows on sublanes)
        body = x_ref[0, ci, pl.ds(row0, TR), :]                    # (TR, W)
        top = x_ref[0, ci, pl.ds(top_start, 1), :] * tmask         # (1, W)
        bot = x_ref[0, ci, pl.ds(bot_start, 1), :] * bmask         # (1, W)
        slab = jnp.concatenate([top, body, bot], axis=0)           # (TR+2, W)

        # three lane-shifted copies (dx = 0,1,2 -> input col x-1, x, x+1),
        # computed once per tile and reused across the three dy taps
        sh = (
            jnp.concatenate([zcol, slab[:, : W - 1]], axis=1),     # dx = 0
            slab,                                                  # dx = 1
            jnp.concatenate([slab[:, 1:], zcol], axis=1),          # dx = 2
        )

        for dx in range(3):
            for dy in range(3):
                win = sh[dx][dy:dy + TR, :]                        # (TR, W)
                for co in range(Cout):
                    accs[co] = accs[co] + w_ref[widx(co, ci, dy, dx)] * win

    sums, sqs = [], []
    for co in range(Cout):
        acc = accs[co] + w_ref[Cout * Cin * 9 + co]                # + conv bias
        y_ref[0, co] = acc
        sums.append(jnp.sum(acc, axis=1, keepdims=True).sum(axis=0, keepdims=True))
        sqs.append(jnp.sum(acc * acc, axis=1, keepdims=True).sum(axis=0, keepdims=True))
    s_ref[0, 0] = jnp.concatenate(sums, axis=0)                    # (Cout, 1)
    q_ref[0, 0] = jnp.concatenate(sqs, axis=0)                     # (Cout, 1)


def _bn_act_kernel(y_ref, ab_ref, o_ref, *, Cout):
    """BN apply + 0.1*(sigmoid(z)-0.5) == 0.05*tanh(z/2), in place over y.

    ab_ref : (2*Cout,) SMEM = [scale_0..scale_{C-1}, shift_0..shift_{C-1}]
    """
    for co in range(Cout):
        z = y_ref[0, co] * ab_ref[co] + ab_ref[Cout + co]
        o_ref[0, co] = 0.05 * jnp.tanh(0.5 * z)


def _vmem_limit(bytes_needed):
    # double-buffered blocks + headroom; clamped so the request stays well under
    # physical VMEM on every generation (v5e/v6e 128 MiB, v7x 64 MiB per TC).
    return int(min(max(2 * bytes_needed + (2 << 20), 16 << 20), 48 << 20))


@jax.jit
def get_disp_forward(x, params):
    """x: [N, Cin, H, W] (NCHW, PyTorch layout). Returns [N, 2, H, W] float32."""
    N, Cin, H, W = x.shape
    w = params["w"].astype(jnp.float32)           # (Cout, Cin, 3, 3)
    b = params["b"].astype(jnp.float32)           # (Cout,)
    Cout = w.shape[0]

    TR = 8 if H % 8 == 0 else H                   # row-tile (sublane) size
    R = H // TR

    x32 = x.astype(jnp.float32)
    wflat = jnp.concatenate([w.reshape(-1), b])   # (Cout*Cin*9 + Cout,) -> SMEM

    # ------------- kernel 1: direct conv + per-tile BN partial sums -----------
    blk1 = 4 * (Cin * H * W + Cout * TR * W + 2 * Cout)
    live1 = 4 * (4 * (TR + 2) * W + Cout * TR * W)
    y, psum, pssq = pl.pallas_call(
        functools.partial(_conv_bn_stats_kernel,
                          Cin=Cin, Cout=Cout, H=H, W=W, TR=TR),
        out_shape=(
            jax.ShapeDtypeStruct((N, Cout, H, W), jnp.float32),
            jax.ShapeDtypeStruct((N, R, Cout, 1), jnp.float32),
            jax.ShapeDtypeStruct((N, R, Cout, 1), jnp.float32),
        ),
        grid=(N, R),
        in_specs=[
            # whole image per sample; block index constant across row tiles
            pl.BlockSpec((1, Cin, H, W), lambda n, r: (n, 0, 0, 0)),
            pl.BlockSpec(memory_space=pltpu.MemorySpace.SMEM),
        ],
        out_specs=(
            pl.BlockSpec((1, Cout, TR, W), lambda n, r: (n, 0, r, 0)),
            pl.BlockSpec((1, 1, Cout, 1), lambda n, r: (n, r, 0, 0)),
            pl.BlockSpec((1, 1, Cout, 1), lambda n, r: (n, r, 0, 0)),
        ),
        compiler_params=pltpu.CompilerParams(
            dimension_semantics=("parallel", "parallel"),
            vmem_limit_bytes=_vmem_limit(blk1 + live1)),
    )(x32, wflat)

    # ------------- BN batch statistics (tiny hierarchical reduction) ----------
    cnt = jnp.float32(N * H * W)
    tot = jnp.sum(psum, axis=(0, 1))[:, 0]                    # (Cout,)
    tot2 = jnp.sum(pssq, axis=(0, 1))[:, 0]                   # (Cout,)
    mean = tot / cnt
    var = jnp.maximum(tot2 / cnt - mean * mean, 0.0)          # cancellation guard
    inv = jax.lax.rsqrt(var + BN_EPS)
    gamma = params["gamma"].astype(jnp.float32)
    beta = params["beta"].astype(jnp.float32)
    scale = gamma * inv
    shift = beta - mean * scale
    ab = jnp.concatenate([scale, shift])                      # (2*Cout,) -> SMEM

    # ------------- kernel 2: BN apply + activation, in place over y -----------
    blk2 = 4 * (2 * Cout * TR * W)
    out = pl.pallas_call(
        functools.partial(_bn_act_kernel, Cout=Cout),
        out_shape=jax.ShapeDtypeStruct((N, Cout, H, W), jnp.float32),
        grid=(N, R),
        in_specs=[
            pl.BlockSpec((1, Cout, TR, W), lambda n, r: (n, 0, r, 0)),
            pl.BlockSpec(memory_space=pltpu.MemorySpace.SMEM),
        ],
        out_specs=pl.BlockSpec((1, Cout, TR, W), lambda n, r: (n, 0, r, 0)),
        input_output_aliases={0: 0},                          # overwrite y
        compiler_params=pltpu.CompilerParams(
            dimension_semantics=("parallel", "parallel"),
            vmem_limit_bytes=_vmem_limit(blk2)),
    )(y, ab)
    return out


def reference_forward(x, params):
    """Pure-JAX/XLA reference of the PyTorch module (training-mode BatchNorm)."""
    w = params["w"]
    b = params["b"]
    y = jax.lax.conv_general_dilated(
        x, w, window_strides=(1, 1), padding=((1, 1), (1, 1)),
        dimension_numbers=("NCHW", "OIHW", "NCHW"),
    ) + b.reshape(1, -1, 1, 1)
    mean = jnp.mean(y, axis=(0, 2, 3), keepdims=True)
    var = jnp.mean(jnp.square(y - mean), axis=(0, 2, 3), keepdims=True)
    z = (y - mean) * jax.lax.rsqrt(var + BN_EPS)
    z = z * params["gamma"].reshape(1, -1, 1, 1) + params["beta"].reshape(1, -1, 1, 1)
    return 0.1 * (jax.nn.sigmoid(z) - 0.5)


def init_params(key, num_in_layers, cout=2, k=3):
    k1, k2 = jax.random.split(key)
    bound = (num_in_layers * k * k) ** -0.5
    return {
        "w": jax.random.uniform(k1, (cout, num_in_layers, k, k), jnp.float32,
                                -bound, bound),
        "b": jax.random.uniform(k2, (cout,), jnp.float32, -bound, bound),
        "gamma": jnp.ones((cout,), jnp.float32),
        "beta": jnp.zeros((cout,), jnp.float32),
    }


if __name__ == "__main__":
    key = jax.random.PRNGKey(0)
    kx, kp = jax.random.split(key)

    N, Cin, H, W = 2, 4, 16, 16
    x = jax.random.normal(kx, (N, Cin, H, W), jnp.float32)   # NCHW, like PyTorch
    params = init_params(kp, Cin)

    out = jax.block_until_ready(get_disp_forward(x, params))

    assert out.shape == (N, 2, H, W), out.shape
    assert bool(jnp.all(jnp.isfinite(out)))

    ref = jax.block_until_ready(reference_forward(x, params))
    err = float(jnp.max(jnp.abs(out - ref)))
    assert err < 1e-4, f"max |pallas - reference| = {err}"

    print("KERNEL_OK")
</pallas_src>

<mosaic_0001>
module attributes {stable_mosaic.version = 11 : i64} {
  func.func @_conv_bn_stats_kernel(%arg0: i32, %arg1: i32, %arg2: memref<1x4x16x16xf32, #tpu.memory_space<vmem>>, %arg3: memref<74xf32, #tpu.memory_space<smem>>, %arg4: memref<1x2x8x16xf32, #tpu.memory_space<vmem>>, %arg5: memref<1x1x2x1xf32, #tpu.memory_space<vmem>>, %arg6: memref<1x1x2x1xf32, #tpu.memory_space<vmem>>) attributes {dimension_semantics = [#tpu.dimension_semantics<parallel>, #tpu.dimension_semantics<parallel>], iteration_bounds = array<i64: 2, 2>, scalar_prefetch = 0 : i64, scratch_operands = 0 : i64, tpu.core_type = #tpu.core_type<tc>, window_params = [{transform_indices = @transform_0, window_bounds = array<i64: 1, 4, 16, 16>}, {transform_indices = @transform_1, window_bounds = array<i64: 74>}, {transform_indices = @transform_2, window_bounds = array<i64: 1, 2, 8, 16>}, {transform_indices = @transform_3, window_bounds = array<i64: 1, 1, 2, 1>}, {transform_indices = @transform_4, window_bounds = array<i64: 1, 1, 2, 1>}]} {
    %c8_i32 = arith.constant 8 : i32
    %0 = arith.muli %arg1, %c8_i32 : i32
    %1 = tpu.assume_multiple %0, 8 : i32
    %c0_i32 = arith.constant 0 : i32
    %2 = arith.cmpi sgt, %arg1, %c0_i32 : i32
    %3 = arith.extui %2 : i1 to i32
    %4 = arith.sitofp %3 : i32 to f32
    %c8_i32_0 = arith.constant 8 : i32
    %5 = arith.addi %1, %c8_i32_0 : i32
    %c16_i32 = arith.constant 16 : i32
    %6 = arith.cmpi slt, %5, %c16_i32 : i32
    %7 = arith.extui %6 : i1 to i32
    %8 = arith.sitofp %7 : i32 to f32
    %c1_i32 = arith.constant 1 : i32
    %9 = arith.subi %1, %c1_i32 : i32
    %c0_i32_1 = arith.constant 0 : i32
    %10 = arith.maxsi %9, %c0_i32_1 : i32
    %c8_i32_2 = arith.constant 8 : i32
    %11 = arith.addi %1, %c8_i32_2 : i32
    %c15_i32 = arith.constant 15 : i32
    %12 = arith.minsi %11, %c15_i32 : i32
    %cst = arith.constant 0.000000e+00 : f32
    %13 = vector.broadcast %cst : f32 to vector<8x16xf32>
    %cst_3 = arith.constant 0.000000e+00 : f32
    %14 = vector.broadcast %cst_3 : f32 to vector<8x16xf32>
    %cst_4 = arith.constant 0.000000e+00 : f32
    %15 = vector.broadcast %cst_4 : f32 to vector<10x1xf32>
    %c0 = arith.constant 0 : index
    %c0_5 = arith.constant 0 : index
    %16 = arith.index_cast %1 : i32 to index
    %c0_6 = arith.constant 0 : index
    %17 = vector.load %arg2[%c0, %c0_5, %16, %c0_6] : memref<1x4x16x16xf32, #tpu.memory_space<vmem>>, vector<1x1x8x16xf32>
    %18 = vector.shape_cast %17 : vector<1x1x8x16xf32> to vector<8x16xf32>
    %c0_7 = arith.constant 0 : index
    %c0_8 = arith.constant 0 : index
    %19 = arith.index_cast %10 : i32 to index
    %c0_9 = arith.constant 0 : index
    %20 = vector.load %arg2[%c0_7, %c0_8, %19, %c0_9] : memref<1x4x16x16xf32, #tpu.memory_space<vmem>>, vector<1x1x1x16xf32>
    %21 = vector.shape_cast %20 : vector<1x1x1x16xf32> to vector<1x16xf32>
    %22 = vector.broadcast %4 : f32 to vector<1x16xf32>
    %23 = arith.mulf %21, %22 : vector<1x16xf32>
    %c0_10 = arith.constant 0 : index
    %c0_11 = arith.constant 0 : index
    %24 = arith.index_cast %12 : i32 to index
    %c0_12 = arith.constant 0 : index
    %25 = vector.load %arg2[%c0_10, %c0_11, %24, %c0_12] : memref<1x4x16x16xf32, #tpu.memory_space<vmem>>, vector<1x1x1x16xf32>
    %26 = vector.shape_cast %25 : vector<1x1x1x16xf32> to vector<1x16xf32>
    %27 = vector.broadcast %8 : f32 to vector<1x16xf32>
    %28 = arith.mulf %26, %27 : vector<1x16xf32>
    %29 = tpu.concatenate %23, %18, %28 in 0 : vector<1x16xf32>, vector<8x16xf32>, vector<1x16xf32> -> vector<10x16xf32>
    %30 = vector.extract_strided_slice %29 {offsets = [0, 0], sizes = [10, 15], strides = [1, 1]} : vector<10x16xf32> to vector<10x15xf32>
    %31 = tpu.concatenate %15, %30 in 1 : vector<10x1xf32>, vector<10x15xf32> -> vector<10x16xf32>
    %32 = vector.extract_strided_slice %29 {offsets = [0, 1], sizes = [10, 15], strides = [1, 1]} : vector<10x16xf32> to vector<10x15xf32>
    %33 = tpu.concatenate %32, %15 in 1 : vector<10x15xf32>, vector<10x1xf32> -> vector<10x16xf32>
    %34 = vector.extract_strided_slice %31 {offsets = [0, 0], sizes = [8, 16], strides = [1, 1]} : vector<10x16xf32> to vector<8x16xf32>
    %c0_13 = arith.constant 0 : index
    %35 = memref.load %arg3[%c0_13] : memref<74xf32, #tpu.memory_space<smem>>
    %36 = vector.broadcast %35 : f32 to vector<8x16xf32>
    %37 = arith.mulf %36, %34 : vector<8x16xf32>
    %38 = arith.addf %13, %37 : vector<8x16xf32>
    %c36 = arith.constant 36 : index
    %39 = memref.load %arg3[%c36] : memref<74xf32, #tpu.memory_space<smem>>
    %40 = vector.broadcast %39 : f32 to vector<8x16xf32>
    %41 = arith.mulf %40, %34 : vector<8x16xf32>
    %42 = arith.addf %14, %41 : vector<8x16xf32>
    %43 = vector.extract_strided_slice %31 {offsets = [1, 0], sizes = [8, 16], strides = [1, 1]} : vector<10x16xf32> to vector<8x16xf32>
    %c3 = arith.constant 3 : index
    %44 = memref.load %arg3[%c3] : memref<74xf32, #tpu.memory_space<smem>>
    %45 = vector.broadcast %44 : f32 to vector<8x16xf32>
    %46 = arith.mulf %45, %43 : vector<8x16xf32>
    %47 = arith.addf %38, %46 : vector<8x16xf32>
    %c39 = arith.constant 39 : index
    %48 = memref.load %arg3[%c39] : memref<74xf32, #tpu.memory_space<smem>>
    %49 = vector.broadcast %48 : f32 to vector<8x16xf32>
    %50 = arith.mulf %49, %43 : vector<8x16xf32>
    %51 = arith.addf %42, %50 : vector<8x16xf32>
    %52 = vector.extract_strided_slice %31 {offsets = [2, 0], sizes = [8, 16], strides = [1, 1]} : vector<10x16xf32> to vector<8x16xf32>
    %c6 = arith.constant 6 : index
    %53 = memref.load %arg3[%c6] : memref<74xf32, #tpu.memory_space<smem>>
    %54 = vector.broadcast %53 : f32 to vector<8x16xf32>
    %55 = arith.mulf %54, %52 : vector<8x16xf32>
    %56 = arith.addf %47, %55 : vector<8x16xf32>
    %c42 = arith.constant 42 : index
    %57 = memref.load %arg3[%c42] : memref<74xf32, #tpu.memory_space<smem>>
    %58 = vector.broadcast %57 : f32 to vector<8x16xf32>
    %59 = arith.mulf %58, %52 : vector<8x16xf32>
    %60 = arith.addf %51, %59 : vector<8x16xf32>
    %61 = vector.extract_strided_slice %29 {offsets = [0, 0], sizes = [8, 16], strides = [1, 1]} : vector<10x16xf32> to vector<8x16xf32>
    %c1 = arith.constant 1 : index
    %62 = memref.load %arg3[%c1] : memref<74xf32, #tpu.memory_space<smem>>
    %63 = vector.broadcast %62 : f32 to vector<8x16xf32>
    %64 = arith.mulf %63, %61 : vector<8x16xf32>
    %65 = arith.addf %56, %64 : vector<8x16xf32>
    %c37 = arith.constant 37 : index
    %66 = memref.load %arg3[%c37] : memref<74xf32, #tpu.memory_space<smem>>
    %67 = vector.broadcast %66 : f32 to vector<8x16xf32>
    %68 = arith.mulf %67, %61 : vector<8x16xf32>
    %69 = arith.addf %60, %68 : vector<8x16xf32>
    %70 = vector.extract_strided_slice %29 {offsets = [1, 0], sizes = [8, 16], strides = [1, 1]} : vector<10x16xf32> to vector<8x16xf32>
    %c4 = arith.constant 4 : index
    %71 = memref.load %arg3[%c4] : memref<74xf32, #tpu.memory_space<smem>>
    %72 = vector.broadcast %71 : f32 to vector<8x16xf32>
    %73 = arith.mulf %72, %70 : vector<8x16xf32>
    %74 = arith.addf %65, %73 : vector<8x16xf32>
    %c40 = arith.constant 40 : index
    %75 = memref.load %arg3[%c40] : memref<74xf32, #tpu.memory_space<smem>>
    %76 = vector.broadcast %75 : f32 to vector<8x16xf32>
    %77 = arith.mulf %76, %70 : vector<8x16xf32>
    %78 = arith.addf %69, %77 : vector<8x16xf32>
    %79 = vector.extract_strided_slice %29 {offsets = [2, 0], sizes = [8, 16], strides = [1, 1]} : vector<10x16xf32> to vector<8x16xf32>
    %c7 = arith.constant 7 : index
    %80 = memref.load %arg3[%c7] : memref<74xf32, #tpu.memory_space<smem>>
    %81 = vector.broadcast %80 : f32 to vector<8x16xf32>
    %82 = arith.mulf %81, %79 : vector<8x16xf32>
    %83 = arith.addf %74, %82 : vector<8x16xf32>
    %c43 = arith.constant 43 : index
    %84 = memref.load %arg3[%c43] : memref<74xf32, #tpu.memory_space<smem>>
    %85 = vector.broadcast %84 : f32 to vector<8x16xf32>
    %86 = arith.mulf %85, %79 : vector<8x16xf32>
    %87 = arith.addf %78, %86 : vector<8x16xf32>
    %88 = vector.extract_strided_slice %33 {offsets = [0, 0], sizes = [8, 16], strides = [1, 1]} : vector<10x16xf32> to vector<8x16xf32>
    %c2 = arith.constant 2 : index
    %89 = memref.load %arg3[%c2] : memref<74xf32, #tpu.memory_space<smem>>
    %90 = vector.broadcast %89 : f32 to vector<8x16xf32>
    %91 = arith.mulf %90, %88 : vector<8x16xf32>
    %92 = arith.addf %83, %91 : vector<8x16xf32>
    %c38 = arith.constant 38 : index
    %93 = memref.load %arg3[%c38] : memref<74xf32, #tpu.memory_space<smem>>
    %94 = vector.broadcast %93 : f32 to vector<8x16xf32>
    %95 = arith.mulf %94, %88 : vector<8x16xf32>
    %96 = arith.addf %87, %95 : vector<8x16xf32>
    %97 = vector.extract_strided_slice %33 {offsets = [1, 0], sizes = [8, 16], strides = [1, 1]} : vector<10x16xf32> to vector<8x16xf32>
    %c5 = arith.constant 5 : index
    %98 = memref.load %arg3[%c5] : memref<74xf32, #tpu.memory_space<smem>>
    %99 = vector.broadcast %98 : f32 to vector<8x16xf32>
    %100 = arith.mulf %99, %97 : vector<8x16xf32>
    %101 = arith.addf %92, %100 : vector<8x16xf32>
    %c41 = arith.constant 41 : index
    %102 = memref.load %arg3[%c41] : memref<74xf32, #tpu.memory_space<smem>>
    %103 = vector.broadcast %102 : f32 to vector<8x16xf32>
    %104 = arith.mulf %103, %97 : vector<8x16xf32>
    %105 = arith.addf %96, %104 : vector<8x16xf32>
    %106 = vector.extract_strided_slice %33 {offsets = [2, 0], sizes = [8, 16], strides = [1, 1]} : vector<10x16xf32> to vector<8x16xf32>
    %c8 = arith.constant 8 : index
    %107 = memref.load %arg3[%c8] : memref<74xf32, #tpu.memory_space<smem>>
    %108 = vector.broadcast %107 : f32 to vector<8x16xf32>
    %109 = arith.mulf %108, %106 : vector<8x16xf32>
    %110 = arith.addf %101, %109 : vector<8x16xf32>
    %c44 = arith.constant 44 : index
    %111 = memref.load %arg3[%c44] : memref<74xf32, #tpu.memory_space<smem>>
    %112 = vector.broadcast %111 : f32 to vector<8x16xf32>
    %113 = arith.mulf %112, %106 : vector<8x16xf32>
    %114 = arith.addf %105, %113 : vector<8x16xf32>
    %c0_14 = arith.constant 0 : index
    %c1_15 = arith.constant 1 : index
    %115 = arith.index_cast %1 : i32 to index
    %c0_16 = arith.constant 0 : index
    %116 = vector.load %arg2[%c0_14, %c1_15, %115, %c0_16] : memref<1x4x16x16xf32, #tpu.memory_space<vmem>>, vector<1x1x8x16xf32>
    %117 = vector.shape_cast %116 : vector<1x1x8x16xf32> to vector<8x16xf32>
    %c0_17 = arith.constant 0 : index
    %c1_18 = arith.constant 1 : index
    %118 = arith.index_cast %10 : i32 to index
    %c0_19 = arith.constant 0 : index
    %119 = vector.load %arg2[%c0_17, %c1_18, %118, %c0_19] : memref<1x4x16x16xf32, #tpu.memory_space<vmem>>, vector<1x1x1x16xf32>
    %120 = vector.shape_cast %119 : vector<1x1x1x16xf32> to vector<1x16xf32>
    %121 = vector.broadcast %4 : f32 to vector<1x16xf32>
    %122 = arith.mulf %120, %121 : vector<1x16xf32>
    %c0_20 = arith.constant 0 : index
    %c1_21 = arith.constant 1 : index
    %123 = arith.index_cast %12 : i32 to index
    %c0_22 = arith.constant 0 : index
    %124 = vector.load %arg2[%c0_20, %c1_21, %123, %c0_22] : memref<1x4x16x16xf32, #tpu.memory_space<vmem>>, vector<1x1x1x16xf32>
    %125 = vector.shape_cast %124 : vector<1x1x1x16xf32> to vector<1x16xf32>
    %126 = vector.broadcast %8 : f32 to vector<1x16xf32>
    %127 = arith.mulf %125, %126 : vector<1x16xf32>
    %128 = tpu.concatenate %122, %117, %127 in 0 : vector<1x16xf32>, vector<8x16xf32>, vector<1x16xf32> -> vector<10x16xf32>
    %129 = vector.extract_strided_slice %128 {offsets = [0, 0], sizes = [10, 15], strides = [1, 1]} : vector<10x16xf32> to vector<10x15xf32>
    %130 = tpu.concatenate %15, %129 in 1 : vector<10x1xf32>, vector<10x15xf32> -> vector<10x16xf32>
    %131 = vector.extract_strided_slice %128 {offsets = [0, 1], sizes = [10, 15], strides = [1, 1]} : vector<10x16xf32> to vector<10x15xf32>
    %132 = tpu.concatenate %131, %15 in 1 : vector<10x15xf32>, vector<10x1xf32> -> vector<10x16xf32>
    %133 = vector.extract_strided_slice %130 {offsets = [0, 0], sizes = [8, 16], strides = [1, 1]} : vector<10x16xf32> to vector<8x16xf32>
    %c9 = arith.constant 9 : index
    %134 = memref.load %arg3[%c9] : memref<74xf32, #tpu.memory_space<smem>>
    %135 = vector.broadcast %134 : f32 to vector<8x16xf32>
    %136 = arith.mulf %135, %133 : vector<8x16xf32>
    %137 = arith.addf %110, %136 : vector<8x16xf32>
    %c45 = arith.constant 45 : index
    %138 = memref.load %arg3[%c45] : memref<74xf32, #tpu.memory_space<smem>>
    %139 = vector.broadcast %138 : f32 to vector<8x16xf32>
    %140 = arith.mulf %139, %133 : vector<8x16xf32>
    %141 = arith.addf %114, %140 : vector<8x16xf32>
    %142 = vector.extract_strided_slice %130 {offsets = [1, 0], sizes = [8, 16], strides = [1, 1]} : vector<10x16xf32> to vector<8x16xf32>
    %c12 = arith.constant 12 : index
    %143 = memref.load %arg3[%c12] : memref<74xf32, #tpu.memory_space<smem>>
    %144 = vector.broadcast %143 : f32 to vector<8x16xf32>
    %145 = arith.mulf %144, %142 : vector<8x16xf32>
    %146 = arith.addf %137, %145 : vector<8x16xf32>
    %c48 = arith.constant 48 : index
    %147 = memref.load %arg3[%c48] : memref<74xf32, #tpu.memory_space<smem>>
    %148 = vector.broadcast %147 : f32 to vector<8x16xf32>
    %149 = arith.mulf %148, %142 : vector<8x16xf32>
    %150 = arith.addf %141, %149 : vector<8x16xf32>
    %151 = vector.extract_strided_slice %130 {offsets = [2, 0], sizes = [8, 16], strides = [1, 1]} : vector<10x16xf32> to vector<8x16xf32>
    %c15 = arith.constant 15 : index
    %152 = memref.load %arg3[%c15] : memref<74xf32, #tpu.memory_space<smem>>
    %153 = vector.broadcast %152 : f32 to vector<8x16xf32>
    %154 = arith.mulf %153, %151 : vector<8x16xf32>
    %155 = arith.addf %146, %154 : vector<8x16xf32>
    %c51 = arith.constant 51 : index
    %156 = memref.load %arg3[%c51] : memref<74xf32, #tpu.memory_space<smem>>
    %157 = vector.broadcast %156 : f32 to vector<8x16xf32>
    %158 = arith.mulf %157, %151 : vector<8x16xf32>
    %159 = arith.addf %150, %158 : vector<8x16xf32>
    %160 = vector.extract_strided_slice %128 {offsets = [0, 0], sizes = [8, 16], strides = [1, 1]} : vector<10x16xf32> to vector<8x16xf32>
    %c10 = arith.constant 10 : index
    %161 = memref.load %arg3[%c10] : memref<74xf32, #tpu.memory_space<smem>>
    %162 = vector.broadcast %161 : f32 to vector<8x16xf32>
    %163 = arith.mulf %162, %160 : vector<8x16xf32>
    %164 = arith.addf %155, %163 : vector<8x16xf32>
    %c46 = arith.constant 46 : index
    %165 = memref.load %arg3[%c46] : memref<74xf32, #tpu.memory_space<smem>>
    %166 = vector.broadcast %165 : f32 to vector<8x16xf32>
    %167 = arith.mulf %166, %160 : vector<8x16xf32>
    %168 = arith.addf %159, %167 : vector<8x16xf32>
    %169 = vector.extract_strided_slice %128 {offsets = [1, 0], sizes = [8, 16], strides = [1, 1]} : vector<10x16xf32> to vector<8x16xf32>
    %c13 = arith.constant 13 : index
    %170 = memref.load %arg3[%c13] : memref<74xf32, #tpu.memory_space<smem>>
    %171 = vector.broadcast %170 : f32 to vector<8x16xf32>
    %172 = arith.mulf %171, %169 : vector<8x16xf32>
    %173 = arith.addf %164, %172 : vector<8x16xf32>
    %c49 = arith.constant 49 : index
    %174 = memref.load %arg3[%c49] : memref<74xf32, #tpu.memory_space<smem>>
    %175 = vector.broadcast %174 : f32 to vector<8x16xf32>
    %176 = arith.mulf %175, %169 : vector<8x16xf32>
    %177 = arith.addf %168, %176 : vector<8x16xf32>
    %178 = vector.extract_strided_slice %128 {offsets = [2, 0], sizes = [8, 16], strides = [1, 1]} : vector<10x16xf32> to vector<8x16xf32>
    %c16 = arith.constant 16 : index
    %179 = memref.load %arg3[%c16] : memref<74xf32, #tpu.memory_space<smem>>
    %180 = vector.broadcast %179 : f32 to vector<8x16xf32>
    %181 = arith.mulf %180, %178 : vector<8x16xf32>
    %182 = arith.addf %173, %181 : vector<8x16xf32>
    %c52 = arith.constant 52 : index
    %183 = memref.load %arg3[%c52] : memref<74xf32, #tpu.memory_space<smem>>
    %184 = vector.broadcast %183 : f32 to vector<8x16xf32>
    %185 = arith.mulf %184, %178 : vector<8x16xf32>
    %186 = arith.addf %177, %185 : vector<8x16xf32>
    %187 = vector.extract_strided_slice %132 {offsets = [0, 0], sizes = [8, 16], strides = [1, 1]} : vector<10x16xf32> to vector<8x16xf32>
    %c11 = arith.constant 11 : index
    %188 = memref.load %arg3[%c11] : memref<74xf32, #tpu.memory_space<smem>>
    %189 = vector.broadcast %188 : f32 to vector<8x16xf32>
    %190 = arith.mulf %189, %187 : vector<8x16xf32>
    %191 = arith.addf %182, %190 : vector<8x16xf32>
    %c47 = arith.constant 47 : index
    %192 = memref.load %arg3[%c47] : memref<74xf32, #tpu.memory_space<smem>>
    %193 = vector.broadcast %192 : f32 to vector<8x16xf32>
    %194 = arith.mulf %193, %187 : vector<8x16xf32>
    %195 = arith.addf %186, %194 : vector<8x16xf32>
    %196 = vector.extract_strided_slice %132 {offsets = [1, 0], sizes = [8, 16], strides = [1, 1]} : vector<10x16xf32> to vector<8x16xf32>
    %c14 = arith.constant 14 : index
    %197 = memref.load %arg3[%c14] : memref<74xf32, #tpu.memory_space<smem>>
    %198 = vector.broadcast %197 : f32 to vector<8x16xf32>
    %199 = arith.mulf %198, %196 : vector<8x16xf32>
    %200 = arith.addf %191, %199 : vector<8x16xf32>
    %c50 = arith.constant 50 : index
    %201 = memref.load %arg3[%c50] : memref<74xf32, #tpu.memory_space<smem>>
    %202 = vector.broadcast %201 : f32 to vector<8x16xf32>
    %203 = arith.mulf %202, %196 : vector<8x16xf32>
    %204 = arith.addf %195, %203 : vector<8x16xf32>
    %205 = vector.extract_strided_slice %132 {offsets = [2, 0], sizes = [8, 16], strides = [1, 1]} : vector<10x16xf32> to vector<8x16xf32>
    %c17 = arith.constant 17 : index
    %206 = memref.load %arg3[%c17] : memref<74xf32, #tpu.memory_space<smem>>
    %207 = vector.broadcast %206 : f32 to vector<8x16xf32>
    %208 = arith.mulf %207, %205 : vector<8x16xf32>
    %209 = arith.addf %200, %208 : vector<8x16xf32>
    %c53 = arith.constant 53 : index
    %210 = memref.load %arg3[%c53] : memref<74xf32, #tpu.memory_space<smem>>
    %211 = vector.broadcast %210 : f32 to vector<8x16xf32>
    %212 = arith.mulf %211, %205 : vector<8x16xf32>
    %213 = arith.addf %204, %212 : vector<8x16xf32>
    %c0_23 = arith.constant 0 : index
    %c2_24 = arith.constant 2 : index
    %214 = arith.index_cast %1 : i32 to index
    %c0_25 = arith.constant 0 : index
    %215 = vector.load %arg2[%c0_23, %c2_24, %214, %c0_25] : memref<1x4x16x16xf32, #tpu.memory_space<vmem>>, vector<1x1x8x16xf32>
    %216 = vector.shape_cast %215 : vector<1x1x8x16xf32> to vector<8x16xf32>
    %c0_26 = arith.constant 0 : index
    %c2_27 = arith.constant 2 : index
    %217 = arith.index_cast %10 : i32 to index
    %c0_28 = arith.constant 0 : index
    %218 = vector.load %arg2[%c0_26, %c2_27, %217, %c0_28] : memref<1x4x16x16xf32, #tpu.memory_space<vmem>>, vector<1x1x1x16xf32>
    %219 = vector.shape_cast %218 : vector<1x1x1x16xf32> to vector<1x16xf32>
    %220 = vector.broadcast %4 : f32 to vector<1x16xf32>
    %221 = arith.mulf %219, %220 : vector<1x16xf32>
    %c0_29 = arith.constant 0 : index
    %c2_30 = arith.constant 2 : index
    %222 = arith.index_cast %12 : i32 to index
    %c0_31 = arith.constant 0 : index
    %223 = vector.load %arg2[%c0_29, %c2_30, %222, %c0_31] : memref<1x4x16x16xf32, #tpu.memory_space<vmem>>, vector<1x1x1x16xf32>
    %224 = vector.shape_cast %223 : vector<1x1x1x16xf32> to vector<1x16xf32>
    %225 = vector.broadcast %8 : f32 to vector<1x16xf32>
    %226 = arith.mulf %224, %225 : vector<1x16xf32>
    %227 = tpu.concatenate %221, %216, %226 in 0 : vector<1x16xf32>, vector<8x16xf32>, vector<1x16xf32> -> vector<10x16xf32>
    %228 = vector.extract_strided_slice %227 {offsets = [0, 0], sizes = [10, 15], strides = [1, 1]} : vector<10x16xf32> to vector<10x15xf32>
    %229 = tpu.concatenate %15, %228 in 1 : vector<10x1xf32>, vector<10x15xf32> -> vector<10x16xf32>
    %230 = vector.extract_strided_slice %227 {offsets = [0, 1], sizes = [10, 15], strides = [1, 1]} : vector<10x16xf32> to vector<10x15xf32>
    %231 = tpu.concatenate %230, %15 in 1 : vector<10x15xf32>, vector<10x1xf32> -> vector<10x16xf32>
    %232 = vector.extract_strided_slice %229 {offsets = [0, 0], sizes = [8, 16], strides = [1, 1]} : vector<10x16xf32> to vector<8x16xf32>
    %c18 = arith.constant 18 : index
    %233 = memref.load %arg3[%c18] : memref<74xf32, #tpu.memory_space<smem>>
    %234 = vector.broadcast %233 : f32 to vector<8x16xf32>
    %235 = arith.mulf %234, %232 : vector<8x16xf32>
    %236 = arith.addf %209, %235 : vector<8x16xf32>
    %c54 = arith.constant 54 : index
    %237 = memref.load %arg3[%c54] : memref<74xf32, #tpu.memory_space<smem>>
    %238 = vector.broadcast %237 : f32 to vector<8x16xf32>
    %239 = arith.mulf %238, %232 : vector<8x16xf32>
    %240 = arith.addf %213, %239 : vector<8x16xf32>
    %241 = vector.extract_strided_slice %229 {offsets = [1, 0], sizes = [8, 16], strides = [1, 1]} : vector<10x16xf32> to vector<8x16xf32>
    %c21 = arith.constant 21 : index
    %242 = memref.load %arg3[%c21] : memref<74xf32, #tpu.memory_space<smem>>
    %243 = vector.broadcast %242 : f32 to vector<8x16xf32>
    %244 = arith.mulf %243, %241 : vector<8x16xf32>
    %245 = arith.addf %236, %244 : vector<8x16xf32>
    %c57 = arith.constant 57 : index
    %246 = memref.load %arg3[%c57] : memref<74xf32, #tpu.memory_space<smem>>
    %247 = vector.broadcast %246 : f32 to vector<8x16xf32>
    %248 = arith.mulf %247, %241 : vector<8x16xf32>
    %249 = arith.addf %240, %248 : vector<8x16xf32>
    %250 = vector.extract_strided_slice %229 {offsets = [2, 0], sizes = [8, 16], strides = [1, 1]} : vector<10x16xf32> to vector<8x16xf32>
    %c24 = arith.constant 24 : index
    %251 = memref.load %arg3[%c24] : memref<74xf32, #tpu.memory_space<smem>>
    %252 = vector.broadcast %251 : f32 to vector<8x16xf32>
    %253 = arith.mulf %252, %250 : vector<8x16xf32>
    %254 = arith.addf %245, %253 : vector<8x16xf32>
    %c60 = arith.constant 60 : index
    %255 = memref.load %arg3[%c60] : memref<74xf32, #tpu.memory_space<smem>>
    %256 = vector.broadcast %255 : f32 to vector<8x16xf32>
    %257 = arith.mulf %256, %250 : vector<8x16xf32>
    %258 = arith.addf %249, %257 : vector<8x16xf32>
    %259 = vector.extract_strided_slice %227 {offsets = [0, 0], sizes = [8, 16], strides = [1, 1]} : vector<10x16xf32> to vector<8x16xf32>
    %c19 = arith.constant 19 : index
    %260 = memref.load %arg3[%c19] : memref<74xf32, #tpu.memory_space<smem>>
    %261 = vector.broadcast %260 : f32 to vector<8x16xf32>
    %262 = arith.mulf %261, %259 : vector<8x16xf32>
    %263 = arith.addf %254, %262 : vector<8x16xf32>
    %c55 = arith.constant 55 : index
    %264 = memref.load %arg3[%c55] : memref<74xf32, #tpu.memory_space<smem>>
    %265 = vector.broadcast %264 : f32 to vector<8x16xf32>
    %266 = arith.mulf %265, %259 : vector<8x16xf32>
    %267 = arith.addf %258, %266 : vector<8x16xf32>
    %268 = vector.extract_strided_slice %227 {offsets = [1, 0], sizes = [8, 16], strides = [1, 1]} : vector<10x16xf32> to vector<8x16xf32>
    %c22 = arith.constant 22 : index
    %269 = memref.load %arg3[%c22] : memref<74xf32, #tpu.memory_space<smem>>
    %270 = vector.broadcast %269 : f32 to vector<8x16xf32>
    %271 = arith.mulf %270, %268 : vector<8x16xf32>
    %272 = arith.addf %263, %271 : vector<8x16xf32>
    %c58 = arith.constant 58 : index
    %273 = memref.load %arg3[%c58] : memref<74xf32, #tpu.memory_space<smem>>
    %274 = vector.broadcast %273 : f32 to vector<8x16xf32>
    %275 = arith.mulf %274, %268 : vector<8x16xf32>
    %276 = arith.addf %267, %275 : vector<8x16xf32>
    %277 = vector.extract_strided_slice %227 {offsets = [2, 0], sizes = [8, 16], strides = [1, 1]} : vector<10x16xf32> to vector<8x16xf32>
    %c25 = arith.constant 25 : index
    %278 = memref.load %arg3[%c25] : memref<74xf32, #tpu.memory_space<smem>>
    %279 = vector.broadcast %278 : f32 to vector<8x16xf32>
    %280 = arith.mulf %279, %277 : vector<8x16xf32>
    %281 = arith.addf %272, %280 : vector<8x16xf32>
    %c61 = arith.constant 61 : index
    %282 = memref.load %arg3[%c61] : memref<74xf32, #tpu.memory_space<smem>>
    %283 = vector.broadcast %282 : f32 to vector<8x16xf32>
    %284 = arith.mulf %283, %277 : vector<8x16xf32>
    %285 = arith.addf %276, %284 : vector<8x16xf32>
    %286 = vector.extract_strided_slice %231 {offsets = [0, 0], sizes = [8, 16], strides = [1, 1]} : vector<10x16xf32> to vector<8x16xf32>
    %c20 = arith.constant 20 : index
    %287 = memref.load %arg3[%c20] : memref<74xf32, #tpu.memory_space<smem>>
    %288 = vector.broadcast %287 : f32 to vector<8x16xf32>
    %289 = arith.mulf %288, %286 : vector<8x16xf32>
    %290 = arith.addf %281, %289 : vector<8x16xf32>
    %c56 = arith.constant 56 : index
    %291 = memref.load %arg3[%c56] : memref<74xf32, #tpu.memory_space<smem>>
    %292 = vector.broadcast %291 : f32 to vector<8x16xf32>
    %293 = arith.mulf %292, %286 : vector<8x16xf32>
    %294 = arith.addf %285, %293 : vector<8x16xf32>
    %295 = vector.extract_strided_slice %231 {offsets = [1, 0], sizes = [8, 16], strides = [1, 1]} : vector<10x16xf32> to vector<8x16xf32>
    %c23 = arith.constant 23 : index
    %296 = memref.load %arg3[%c23] : memref<74xf32, #tpu.memory_space<smem>>
    %297 = vector.broadcast %296 : f32 to vector<8x16xf32>
    %298 = arith.mulf %297, %295 : vector<8x16xf32>
    %299 = arith.addf %290, %298 : vector<8x16xf32>
    %c59 = arith.constant 59 : index
    %300 = memref.load %arg3[%c59] : memref<74xf32, #tpu.memory_space<smem>>
    %301 = vector.broadcast %300 : f32 to vector<8x16xf32>
    %302 = arith.mulf %301, %295 : vector<8x16xf32>
    %303 = arith.addf %294, %302 : vector<8x16xf32>
    %304 = vector.extract_strided_slice %231 {offsets = [2, 0], sizes = [8, 16], strides = [1, 1]} : vector<10x16xf32> to vector<8x16xf32>
    %c26 = arith.constant 26 : index
    %305 = memref.load %arg3[%c26] : memref<74xf32, #tpu.memory_space<smem>>
    %306 = vector.broadcast %305 : f32 to vector<8x16xf32>
    %307 = arith.mulf %306, %304 : vector<8x16xf32>
    %308 = arith.addf %299, %307 : vector<8x16xf32>
    %c62 = arith.constant 62 : index
    %309 = memref.load %arg3[%c62] : memref<74xf32, #tpu.memory_space<smem>>
    %310 = vector.broadcast %309 : f32 to vector<8x16xf32>
    %311 = arith.mulf %310, %304 : vector<8x16xf32>
    %312 = arith.addf %303, %311 : vector<8x16xf32>
    %c0_32 = arith.constant 0 : index
    %c3_33 = arith.constant 3 : index
    %313 = arith.index_cast %1 : i32 to index
    %c0_34 = arith.constant 0 : index
    %314 = vector.load %arg2[%c0_32, %c3_33, %313, %c0_34] : memref<1x4x16x16xf32, #tpu.memory_space<vmem>>, vector<1x1x8x16xf32>
    %315 = vector.shape_cast %314 : vector<1x1x8x16xf32> to vector<8x16xf32>
    %c0_35 = arith.constant 0 : index
    %c3_36 = arith.constant 3 : index
    %316 = arith.index_cast %10 : i32 to index
    %c0_37 = arith.constant 0 : index
    %317 = vector.load %arg2[%c0_35, %c3_36, %316, %c0_37] : memref<1x4x16x16xf32, #tpu.memory_space<vmem>>, vector<1x1x1x16xf32>
    %318 = vector.shape_cast %317 : vector<1x1x1x16xf32> to vector<1x16xf32>
    %319 = vector.broadcast %4 : f32 to vector<1x16xf32>
    %320 = arith.mulf %318, %319 : vector<1x16xf32>
    %c0_38 = arith.constant 0 : index
    %c3_39 = arith.constant 3 : index
    %321 = arith.index_cast %12 : i32 to index
    %c0_40 = arith.constant 0 : index
    %322 = vector.load %arg2[%c0_38, %c3_39, %321, %c0_40] : memref<1x4x16x16xf32, #tpu.memory_space<vmem>>, vector<1x1x1x16xf32>
    %323 = vector.shape_cast %322 : vector<1x1x1x16xf32> to vector<1x16xf32>
    %324 = vector.broadcast %8 : f32 to vector<1x16xf32>
    %325 = arith.mulf %323, %324 : vector<1x16xf32>
    %326 = tpu.concatenate %320, %315, %325 in 0 : vector<1x16xf32>, vector<8x16xf32>, vector<1x16xf32> -> vector<10x16xf32>
    %327 = vector.extract_strided_slice %326 {offsets = [0, 0], sizes = [10, 15], strides = [1, 1]} : vector<10x16xf32> to vector<10x15xf32>
    %328 = tpu.concatenate %15, %327 in 1 : vector<10x1xf32>, vector<10x15xf32> -> vector<10x16xf32>
    %329 = vector.extract_strided_slice %326 {offsets = [0, 1], sizes = [10, 15], strides = [1, 1]} : vector<10x16xf32> to vector<10x15xf32>
    %330 = tpu.concatenate %329, %15 in 1 : vector<10x15xf32>, vector<10x1xf32> -> vector<10x16xf32>
    %331 = vector.extract_strided_slice %328 {offsets = [0, 0], sizes = [8, 16], strides = [1, 1]} : vector<10x16xf32> to vector<8x16xf32>
    %c27 = arith.constant 27 : index
    %332 = memref.load %arg3[%c27] : memref<74xf32, #tpu.memory_space<smem>>
    %333 = vector.broadcast %332 : f32 to vector<8x16xf32>
    %334 = arith.mulf %333, %331 : vector<8x16xf32>
    %335 = arith.addf %308, %334 : vector<8x16xf32>
    %c63 = arith.constant 63 : index
    %336 = memref.load %arg3[%c63] : memref<74xf32, #tpu.memory_space<smem>>
    %337 = vector.broadcast %336 : f32 to vector<8x16xf32>
    %338 = arith.mulf %337, %331 : vector<8x16xf32>
    %339 = arith.addf %312, %338 : vector<8x16xf32>
    %340 = vector.extract_strided_slice %328 {offsets = [1, 0], sizes = [8, 16], strides = [1, 1]} : vector<10x16xf32> to vector<8x16xf32>
    %c30 = arith.constant 30 : index
    %341 = memref.load %arg3[%c30] : memref<74xf32, #tpu.memory_space<smem>>
    %342 = vector.broadcast %341 : f32 to vector<8x16xf32>
    %343 = arith.mulf %342, %340 : vector<8x16xf32>
    %344 = arith.addf %335, %343 : vector<8x16xf32>
    %c66 = arith.constant 66 : index
    %345 = memref.load %arg3[%c66] : memref<74xf32, #tpu.memory_space<smem>>
    %346 = vector.broadcast %345 : f32 to vector<8x16xf32>
    %347 = arith.mulf %346, %340 : vector<8x16xf32>
    %348 = arith.addf %339, %347 : vector<8x16xf32>
    %349 = vector.extract_strided_slice %328 {offsets = [2, 0], sizes = [8, 16], strides = [1, 1]} : vector<10x16xf32> to vector<8x16xf32>
    %c33 = arith.constant 33 : index
    %350 = memref.load %arg3[%c33] : memref<74xf32, #tpu.memory_space<smem>>
    %351 = vector.broadcast %350 : f32 to vector<8x16xf32>
    %352 = arith.mulf %351, %349 : vector<8x16xf32>
    %353 = arith.addf %344, %352 : vector<8x16xf32>
    %c69 = arith.constant 69 : index
    %354 = memref.load %arg3[%c69] : memref<74xf32, #tpu.memory_space<smem>>
    %355 = vector.broadcast %354 : f32 to vector<8x16xf32>
    %356 = arith.mulf %355, %349 : vector<8x16xf32>
    %357 = arith.addf %348, %356 : vector<8x16xf32>
    %358 = vector.extract_strided_slice %326 {offsets = [0, 0], sizes = [8, 16], strides = [1, 1]} : vector<10x16xf32> to vector<8x16xf32>
    %c28 = arith.constant 28 : index
    %359 = memref.load %arg3[%c28] : memref<74xf32, #tpu.memory_space<smem>>
    %360 = vector.broadcast %359 : f32 to vector<8x16xf32>
    %361 = arith.mulf %360, %358 : vector<8x16xf32>
    %362 = arith.addf %353, %361 : vector<8x16xf32>
    %c64 = arith.constant 64 : index
    %363 = memref.load %arg3[%c64] : memref<74xf32, #tpu.memory_space<smem>>
    %364 = vector.broadcast %363 : f32 to vector<8x16xf32>
    %365 = arith.mulf %364, %358 : vector<8x16xf32>
    %366 = arith.addf %357, %365 : vector<8x16xf32>
    %367 = vector.extract_strided_slice %326 {offsets = [1, 0], sizes = [8, 16], strides = [1, 1]} : vector<10x16xf32> to vector<8x16xf32>
    %c31 = arith.constant 31 : index
    %368 = memref.load %arg3[%c31] : memref<74xf32, #tpu.memory_space<smem>>
    %369 = vector.broadcast %368 : f32 to vector<8x16xf32>
    %370 = arith.mulf %369, %367 : vector<8x16xf32>
    %371 = arith.addf %362, %370 : vector<8x16xf32>
    %c67 = arith.constant 67 : index
    %372 = memref.load %arg3[%c67] : memref<74xf32, #tpu.memory_space<smem>>
    %373 = vector.broadcast %372 : f32 to vector<8x16xf32>
    %374 = arith.mulf %373, %367 : vector<8x16xf32>
    %375 = arith.addf %366, %374 : vector<8x16xf32>
    %376 = vector.extract_strided_slice %326 {offsets = [2, 0], sizes = [8, 16], strides = [1, 1]} : vector<10x16xf32> to vector<8x16xf32>
    %c34 = arith.constant 34 : index
    %377 = memref.load %arg3[%c34] : memref<74xf32, #tpu.memory_space<smem>>
    %378 = vector.broadcast %377 : f32 to vector<8x16xf32>
    %379 = arith.mulf %378, %376 : vector<8x16xf32>
    %380 = arith.addf %371, %379 : vector<8x16xf32>
    %c70 = arith.constant 70 : index
    %381 = memref.load %arg3[%c70] : memref<74xf32, #tpu.memory_space<smem>>
    %382 = vector.broadcast %381 : f32 to vector<8x16xf32>
    %383 = arith.mulf %382, %376 : vector<8x16xf32>
    %384 = arith.addf %375, %383 : vector<8x16xf32>
    %385 = vector.extract_strided_slice %330 {offsets = [0, 0], sizes = [8, 16], strides = [1, 1]} : vector<10x16xf32> to vector<8x16xf32>
    %c29 = arith.constant 29 : index
    %386 = memref.load %arg3[%c29] : memref<74xf32, #tpu.memory_space<smem>>
    %387 = vector.broadcast %386 : f32 to vector<8x16xf32>
    %388 = arith.mulf %387, %385 : vector<8x16xf32>
    %389 = arith.addf %380, %388 : vector<8x16xf32>
    %c65 = arith.constant 65 : index
    %390 = memref.load %arg3[%c65] : memref<74xf32, #tpu.memory_space<smem>>
    %391 = vector.broadcast %390 : f32 to vector<8x16xf32>
    %392 = arith.mulf %391, %385 : vector<8x16xf32>
    %393 = arith.addf %384, %392 : vector<8x16xf32>
    %394 = vector.extract_strided_slice %330 {offsets = [1, 0], sizes = [8, 16], strides = [1, 1]} : vector<10x16xf32> to vector<8x16xf32>
    %c32 = arith.constant 32 : index
    %395 = memref.load %arg3[%c32] : memref<74xf32, #tpu.memory_space<smem>>
    %396 = vector.broadcast %395 : f32 to vector<8x16xf32>
    %397 = arith.mulf %396, %394 : vector<8x16xf32>
    %398 = arith.addf %389, %397 : vector<8x16xf32>
    %c68 = arith.constant 68 : index
    %399 = memref.load %arg3[%c68] : memref<74xf32, #tpu.memory_space<smem>>
    %400 = vector.broadcast %399 : f32 to vector<8x16xf32>
    %401 = arith.mulf %400, %394 : vector<8x16xf32>
    %402 = arith.addf %393, %401 : vector<8x16xf32>
    %403 = vector.extract_strided_slice %330 {offsets = [2, 0], sizes = [8, 16], strides = [1, 1]} : vector<10x16xf32> to vector<8x16xf32>
    %c35 = arith.constant 35 : index
    %404 = memref.load %arg3[%c35] : memref<74xf32, #tpu.memory_space<smem>>
    %405 = vector.broadcast %404 : f32 to vector<8x16xf32>
    %406 = arith.mulf %405, %403 : vector<8x16xf32>
    %407 = arith.addf %398, %406 : vector<8x16xf32>
    %c71 = arith.constant 71 : index
    %408 = memref.load %arg3[%c71] : memref<74xf32, #tpu.memory_space<smem>>
    %409 = vector.broadcast %408 : f32 to vector<8x16xf32>
    %410 = arith.mulf %409, %403 : vector<8x16xf32>
    %411 = arith.addf %402, %410 : vector<8x16xf32>
    %c72 = arith.constant 72 : index
    %412 = memref.load %arg3[%c72] : memref<74xf32, #tpu.memory_space<smem>>
    %413 = vector.broadcast %412 : f32 to vector<8x16xf32>
    %414 = arith.addf %407, %413 : vector<8x16xf32>
    %c0_41 = arith.constant 0 : index
    %c0_42 = arith.constant 0 : index
    %c0_43 = arith.constant 0 : index
    %c0_44 = arith.constant 0 : index
    %415 = vector.load %arg4[%c0_41, %c0_42, %c0_43, %c0_44] : memref<1x2x8x16xf32, #tpu.memory_space<vmem>>, vector<1x1x8x16xf32>
    %416 = vector.shape_cast %415 : vector<1x1x8x16xf32> to vector<8x16xf32>
    %417 = vector.shape_cast %414 : vector<8x16xf32> to vector<1x1x8x16xf32>
    tpu.vector_store %arg4[%c0_41, %c0_42, %c0_43, %c0_44], %417 {strides = array<i32>} : memref<1x2x8x16xf32, #tpu.memory_space<vmem>>, vector<1x1x8x16xf32>,
    %cst_45 = arith.constant dense<0.000000e+00> : vector<8xf32>
    %418 = vector.multi_reduction <add>, %414, %cst_45 [1] : vector<8x16xf32> to vector<8xf32>
    %419 = vector.shape_cast %418 : vector<8xf32> to vector<8x1xf32>
    %cst_46 = arith.constant dense<0.000000e+00> : vector<1xf32>
    %420 = vector.multi_reduction <add>, %419, %cst_46 [0] : vector<8x1xf32> to vector<1xf32>
    %421 = vector.shape_cast %420 : vector<1xf32> to vector<1x1xf32>
    %422 = arith.mulf %414, %414 : vector<8x16xf32>
    %cst_47 = arith.constant dense<0.000000e+00> : vector<8xf32>
    %423 = vector.multi_reduction <add>, %422, %cst_47 [1] : vector<8x16xf32> to vector<8xf32>
    %424 = vector.shape_cast %423 : vector<8xf32> to vector<8x1xf32>
    %cst_48 = arith.constant dense<0.000000e+00> : vector<1xf32>
    %425 = vector.multi_reduction <add>, %424, %cst_48 [0] : vector<8x1xf32> to vector<1xf32>
    %426 = vector.shape_cast %425 : vector<1xf32> to vector<1x1xf32>
    %c73 = arith.constant 73 : index
    %427 = memref.load %arg3[%c73] : memref<74xf32, #tpu.memory_space<smem>>
    %428 = vector.broadcast %427 : f32 to vector<8x16xf32>
    %429 = arith.addf %411, %428 : vector<8x16xf32>
    %c0_49 = arith.constant 0 : index
    %c1_50 = arith.constant 1 : index
    %c0_51 = arith.constant 0 : index
    %c0_52 = arith.constant 0 : index
    %430 = vector.load %arg4[%c0_49, %c1_50, %c0_51, %c0_52] : memref<1x2x8x16xf32, #tpu.memory_space<vmem>>, vector<1x1x8x16xf32>
    %431 = vector.shape_cast %430 : vector<1x1x8x16xf32> to vector<8x16xf32>
    %432 = vector.shape_cast %429 : vector<8x16xf32> to vector<1x1x8x16xf32>
    tpu.vector_store %arg4[%c0_49, %c1_50, %c0_51, %c0_52], %432 {strides = array<i32>} : memref<1x2x8x16xf32, #tpu.memory_space<vmem>>, vector<1x1x8x16xf32>,
    %cst_53 = arith.constant dense<0.000000e+00> : vector<8xf32>
    %433 = vector.multi_reduction <add>, %429, %cst_53 [1] : vector<8x16xf32> to vector<8xf32>
    %434 = vector.shape_cast %433 : vector<8xf32> to vector<8x1xf32>
    %cst_54 = arith.constant dense<0.000000e+00> : vector<1xf32>
    %435 = vector.multi_reduction <add>, %434, %cst_54 [0] : vector<8x1xf32> to vector<1xf32>
    %436 = vector.shape_cast %435 : vector<1xf32> to vector<1x1xf32>
    %437 = arith.mulf %429, %429 : vector<8x16xf32>
    %cst_55 = arith.constant dense<0.000000e+00> : vector<8xf32>
    %438 = vector.multi_reduction <add>, %437, %cst_55 [1] : vector<8x16xf32> to vector<8xf32>
    %439 = vector.shape_cast %438 : vector<8xf32> to vector<8x1xf32>
    %cst_56 = arith.constant dense<0.000000e+00> : vector<1xf32>
    %440 = vector.multi_reduction <add>, %439, %cst_56 [0] : vector<8x1xf32> to vector<1xf32>
    %441 = vector.shape_cast %440 : vector<1xf32> to vector<1x1xf32>
    %442 = tpu.concatenate %421, %436 in 0 : vector<1x1xf32>, vector<1x1xf32> -> vector<2x1xf32>
    %c0_57 = arith.constant 0 : index
    %c0_58 = arith.constant 0 : index
    %c0_59 = arith.constant 0 : index
    %c0_60 = arith.constant 0 : index
    %443 = vector.load %arg5[%c0_57, %c0_58, %c0_59, %c0_60] : memref<1x1x2x1xf32, #tpu.memory_space<vmem>>, vector<1x1x2x1xf32>
    %444 = vector.shape_cast %443 : vector<1x1x2x1xf32> to vector<2x1xf32>
    %445 = vector.shape_cast %442 : vector<2x1xf32> to vector<1x1x2x1xf32>
    tpu.vector_store %arg5[%c0_57, %c0_58, %c0_59, %c0_60], %445 {strides = array<i32>} : memref<1x1x2x1xf32, #tpu.memory_space<vmem>>, vector<1x1x2x1xf32>,
    %446 = tpu.concatenate %426, %441 in 0 : vector<1x1xf32>, vector<1x1xf32> -> vector<2x1xf32>
    %c0_61 = arith.constant 0 : index
    %c0_62 = arith.constant 0 : index
    %c0_63 = arith.constant 0 : index
    %c0_64 = arith.constant 0 : index
    %447 = vector.load %arg6[%c0_61, %c0_62, %c0_63, %c0_64] : memref<1x1x2x1xf32, #tpu.memory_space<vmem>>, vector<1x1x2x1xf32>
    %448 = vector.shape_cast %447 : vector<1x1x2x1xf32> to vector<2x1xf32>
    %449 = vector.shape_cast %446 : vector<2x1xf32> to vector<1x1x2x1xf32>
    tpu.vector_store %arg6[%c0_61, %c0_62, %c0_63, %c0_64], %449 {strides = array<i32>} : memref<1x1x2x1xf32, #tpu.memory_space<vmem>>, vector<1x1x2x1xf32>,
    return
  }
  func.func @transform_0(%arg0: i32, %arg1: i32) -> (i32, i32, i32, i32) {
    %c0_i32 = arith.constant 0 : i32
    %c0_i32_0 = arith.constant 0 : i32
    %c0_i32_1 = arith.constant 0 : i32
    %c0_i32_2 = arith.constant 0 : i32
    return %arg0, %c0_i32, %c0_i32_0, %c0_i32_1 : i32, i32, i32, i32
  }
  func.func @transform_1(%arg0: i32, %arg1: i32) -> i32 {
    %c0_i32 = arith.constant 0 : i32
    %c0_i32_0 = arith.constant 0 : i32
    return %c0_i32 : i32
  }
  func.func @transform_2(%arg0: i32, %arg1: i32) -> (i32, i32, i32, i32) {
    %c0_i32 = arith.constant 0 : i32
    %c0_i32_0 = arith.constant 0 : i32
    %c0_i32_1 = arith.constant 0 : i32
    return %arg0, %c0_i32, %arg1, %c0_i32_0 : i32, i32, i32, i32
  }
  func.func @transform_3(%arg0: i32, %arg1: i32) -> (i32, i32, i32, i32) {
    %c0_i32 = arith.constant 0 : i32
    %c0_i32_0 = arith.constant 0 : i32
    %c0_i32_1 = arith.constant 0 : i32
    return %arg0, %arg1, %c0_i32, %c0_i32_0 : i32, i32, i32, i32
  }
  func.func @transform_4(%arg0: i32, %arg1: i32) -> (i32, i32, i32, i32) {
    %c0_i32 = arith.constant 0 : i32
    %c0_i32_0 = arith.constant 0 : i32
    %c0_i32_1 = arith.constant 0 : i32
    return %arg0, %arg1, %c0_i32, %c0_i32_0 : i32, i32, i32, i32
  }
}

module attributes {stable_mosaic.version = 11 : i64} {
  func.func @_bn_act_kernel(%arg0: i32, %arg1: i32, %arg2: memref<1x2x8x16xf32, #tpu.memory_space<vmem>>, %arg3: memref<4xf32, #tpu.memory_space<smem>>, %arg4: memref<1x2x8x16xf32, #tpu.memory_space<vmem>>) attributes {dimension_semantics = [#tpu.dimension_semantics<parallel>, #tpu.dimension_semantics<parallel>], iteration_bounds = array<i64: 2, 2>, scalar_prefetch = 0 : i64, scratch_operands = 0 : i64, tpu.core_type = #tpu.core_type<tc>, window_params = [{transform_indices = @transform_0, window_bounds = array<i64: 1, 2, 8, 16>}, {transform_indices = @transform_1, window_bounds = array<i64: 4>}, {transform_indices = @transform_2, window_bounds = array<i64: 1, 2, 8, 16>}]} {
    %c0 = arith.constant 0 : index
    %c0_0 = arith.constant 0 : index
    %c0_1 = arith.constant 0 : index
    %c0_2 = arith.constant 0 : index
    %0 = vector.load %arg2[%c0, %c0_0, %c0_1, %c0_2] : memref<1x2x8x16xf32, #tpu.memory_space<vmem>>, vector<1x1x8x16xf32>
    %1 = vector.shape_cast %0 : vector<1x1x8x16xf32> to vector<8x16xf32>
    %c0_3 = arith.constant 0 : index
    %2 = memref.load %arg3[%c0_3] : memref<4xf32, #tpu.memory_space<smem>>
    %3 = vector.broadcast %2 : f32 to vector<8x16xf32>
    %4 = arith.mulf %1, %3 : vector<8x16xf32>
    %c2 = arith.constant 2 : index
    %5 = memref.load %arg3[%c2] : memref<4xf32, #tpu.memory_space<smem>>
    %6 = vector.broadcast %5 : f32 to vector<8x16xf32>
    %7 = arith.addf %4, %6 : vector<8x16xf32>
    %cst = arith.constant 5.000000e-01 : f32
    %8 = vector.broadcast %cst : f32 to vector<8x16xf32>
    %9 = arith.mulf %8, %7 : vector<8x16xf32>
    %10 = math.tanh %9 : vector<8x16xf32>
    %cst_4 = arith.constant 5.000000e-02 : f32
    %11 = vector.broadcast %cst_4 : f32 to vector<8x16xf32>
    %12 = arith.mulf %11, %10 : vector<8x16xf32>
    %c0_5 = arith.constant 0 : index
    %c0_6 = arith.constant 0 : index
    %c0_7 = arith.constant 0 : index
    %c0_8 = arith.constant 0 : index
    %13 = vector.load %arg4[%c0_5, %c0_6, %c0_7, %c0_8] : memref<1x2x8x16xf32, #tpu.memory_space<vmem>>, vector<1x1x8x16xf32>
    %14 = vector.shape_cast %13 : vector<1x1x8x16xf32> to vector<8x16xf32>
    %15 = vector.shape_cast %12 : vector<8x16xf32> to vector<1x1x8x16xf32>
    tpu.vector_store %arg4[%c0_5, %c0_6, %c0_7, %c0_8], %15 {strides = array<i32>} : memref<1x2x8x16xf32, #tpu.memory_space<vmem>>, vector<1x1x8x16xf32>,
    %c0_9 = arith.constant 0 : index
    %c1 = arith.constant 1 : index
    %c0_10 = arith.constant 0 : index
    %c0_11 = arith.constant 0 : index
    %16 = vector.load %arg2[%c0_9, %c1, %c0_10, %c0_11] : memref<1x2x8x16xf32, #tpu.memory_space<vmem>>, vector<1x1x8x16xf32>
    %17 = vector.shape_cast %16 : vector<1x1x8x16xf32> to vector<8x16xf32>
    %c1_12 = arith.constant 1 : index
    %18 = memref.load %arg3[%c1_12] : memref<4xf32, #tpu.memory_space<smem>>
    %19 = vector.broadcast %18 : f32 to vector<8x16xf32>
    %20 = arith.mulf %17, %19 : vector<8x16xf32>
    %c3 = arith.constant 3 : index
    %21 = memref.load %arg3[%c3] : memref<4xf32, #tpu.memory_space<smem>>
    %22 = vector.broadcast %21 : f32 to vector<8x16xf32>
    %23 = arith.addf %20, %22 : vector<8x16xf32>
    %cst_13 = arith.constant 5.000000e-01 : f32
    %24 = vector.broadcast %cst_13 : f32 to vector<8x16xf32>
    %25 = arith.mulf %24, %23 : vector<8x16xf32>
    %26 = math.tanh %25 : vector<8x16xf32>
    %cst_14 = arith.constant 5.000000e-02 : f32
    %27 = vector.broadcast %cst_14 : f32 to vector<8x16xf32>
    %28 = arith.mulf %27, %26 : vector<8x16xf32>
    %c0_15 = arith.constant 0 : index
    %c1_16 = arith.constant 1 : index
    %c0_17 = arith.constant 0 : index
    %c0_18 = arith.constant 0 : index
    %29 = vector.load %arg4[%c0_15, %c1_16, %c0_17, %c0_18] : memref<1x2x8x16xf32, #tpu.memory_space<vmem>>, vector<1x1x8x16xf32>
    %30 = vector.shape_cast %29 : vector<1x1x8x16xf32> to vector<8x16xf32>
    %31 = vector.shape_cast %28 : vector<8x16xf32> to vector<1x1x8x16xf32>
    tpu.vector_store %arg4[%c0_15, %c1_16, %c0_17, %c0_18], %31 {strides = array<i32>} : memref<1x2x8x16xf32, #tpu.memory_space<vmem>>, vector<1x1x8x16xf32>,
    return
  }
  func.func @transform_0(%arg0: i32, %arg1: i32) -> (i32, i32, i32, i32) {
    %c0_i32 = arith.constant 0 : i32
    %c0_i32_0 = arith.constant 0 : i32
    %c0_i32_1 = arith.constant 0 : i32
    return %arg0, %c0_i32, %arg1, %c0_i32_0 : i32, i32, i32, i32
  }
  func.func @transform_1(%arg0: i32, %arg1: i32) -> i32 {
    %c0_i32 = arith.constant 0 : i32
    %c0_i32_0 = arith.constant 0 : i32
    return %c0_i32 : i32
  }
  func.func @transform_2(%arg0: i32, %arg1: i32) -> (i32, i32, i32, i32) {
    %c0_i32 = arith.constant 0 : i32
    %c0_i32_0 = arith.constant 0 : i32
    %c0_i32_1 = arith.constant 0 : i32
    return %arg0, %c0_i32, %arg1, %c0_i32_0 : i32, i32, i32, i32
  }
}

</mosaic_0001>

<bundles_post_ra>
// kernel: get_disp_forward.3
= control target key start
LH: loop header
LB: loop body
LE: loop exit
PB: predicated region body
PF: predicated region fallthrough
CT: control target
= control target key end

     0   :  { %s808_s0 = inlined_call_operand.hbm [shape: f32[2,2,16,16], index: 0, kind: input, shape index: {}, may-alias: {0,2}]   ;;  %s809_s1 = inlined_call_operand.vmem [shape: f32[4], index: 1, kind: input, shape index: {}]   ;;  %s810_s2 = inlined_call_operand.hbm [shape: f32[2,2,16,16], index: 2, kind: output, shape index: {}, may-alias: {0,2}]  }
   0x1   :  { %817 = sst [smem:[#allocation14_spill]] %s809_s1 }
   0x2   :  { %7 = vsyncpa [#allocation3], 0 }
   0x3   :  { %9 = vsyncpa [#allocation3 + $0x1], 0 }
   0x4   :  { %10 = vsyncpa [#allocation5], 0 }
   0x5   :  { %11 = vsyncpa [#allocation4], 0 }
   0x6   :  { %13 = vsyncpa [#allocation4 + $0x1], 0  ;;  %s623_s9 = smov 0   ;;  %s625_s10 = smov 0  }
   0x7   :  { %s627_s11 = smov 0   ;;  %s629_s12 = smov 0  }
   0x8   :  { %s631_s13 = smov 0   ;;  %s633_s14 = smov 0  }
   0x9   :  { %s635_s15 = smov 0   ;;  %s637_s16 = smov 0  }
   0xa LB: > { %818 = sst [smem:[#allocation11_spill]] %s569_s9  ;;  %s333_s17 = sadd.s32 4294967295, %s597_s16   ;;  %s597_s16 = sphi %s637_s16, %s19_s16   ;;  %s593_s15 = sphi %s635_s15, %s843_s15   ;;  %s589_s14 = sphi %s633_s14, %s842_s14   ;;  %s585_s13 = sphi %s631_s13, %s841_s13   ;;  %s581_s12 = sphi %s629_s12, %s840_s12   ;;  %s577_s11 = sphi %s627_s11, %s839_s11   ;;  %s573_s10 = sphi %s625_s10, %s838_s10   ;;  %s569_s9 = sphi %s623_s9, %s837_s9  }
   0xb   : > { %s334_s18 = sadd.s32 4294967294, %s597_s16   ;;  %p47_p0 = scmp.ne.s32.totalorder %s577_s11, %s573_s10 }
   0xc   : > { %p48_p1 = scmp.eq.s32.totalorder %s597_s16, 0  ;;  %p53_p2 = scmp.ne.s32.totalorder %s573_s10, %s569_s9 }
   0xd   : > { %p671_p3 = scmp.eq.s32.totalorder %s333_s17, 0  ;;  %p100_p4 = scmp.eq.s32.totalorder %s333_s17, 3 }
   0xe   : > { %p49_p5 = por %p48_p1, %p47_p0  ;;  %p106_p6 = scmp.eq.s32.totalorder %s334_s18, 3 }
   0xf   : > { %p677_p7 = por %p671_p3, %p53_p2  ;;  %p681_p8 = por %p100_p4, %p47_p0 }
  0x10   : > { %p685_p9 = por %p106_p6, %p53_p2  ;;  %p335_p10 = scmp.ge.s32.totalorder %s597_s16, 1 }
  0x11   : > { %s820_s21 = scalar_select %p677_p7, 1, 0 }
  0x12   : > { %s821_s22 = scalar_select %p681_p8, 1, 0 }
  0x13   : > { %s822_s23 = scalar_select %p685_p9, 1, 0 }
  0x14   : > { %p113_p11 = scmp.lt.s32.totalorder %s597_s16, 5  ;;  %s824_s1 = sld [smem:[#allocation14_spill]] }
  0x15   : > { %823 = sst [smem:[#allocation12_spill]] %s822_s23  ;;  %p376_p13 = scmp.lt.s32.totalorder %s597_s16, 4 }
  0x16   : > { %p694_p12 = pnand %p335_p10, %p113_p11  ;;  %s28_s29 = sadd.s32 1, %s589_s14 }
  0x17   : > { %p701_p1 = pnand %p376_p13, %p49_p5 }
  0x18   : > { %s825_s27 = scalar_select %p694_p12, 1, 0 }
  0x19   : > { %p363_p0 = pneg %p694_p12 }
  0x1a   : > { %s126_s26 = sshll.u32 %s824_s1, 4  ;;  %s127_s26 = int_to_ptr.vmem [resolvable:$true] %s126_s26 }
  0x1b   : > { %p364_p2 = pnand %p363_p0, %p671_p3  ;;  %s454_s30 = scalar_lea.vmem %s127_s26, 16 }
  0x1c   : > { %p455_p4 = scmp.ne.s32.totalorder %s127_s26, %s454_s30  ;;  %p462_p11 = scmp.lt.s32.totalorder %s127_s26, %s127_s26 }
  0x1d   : > { %p456_p6 = pneg %p364_p2  ;;  %p463_p8 = scmp.lt.s32.totalorder %s454_s30, %s454_s30 }
  0x1f   : > { %p457_p9 = pnand %p456_p6, %p455_p4  ;;  %p464_p7 = por %p463_p8, %p462_p11 }
  0x21   : > { %p458_p10 = pneg %p457_p9 }
  0x23   : > { %p465_p12 = pnand %p464_p7, %p458_p10 }
  0x25   : > { %468 = shalt.err (!%p465_p12)
}
  0x26   : > { %s599_s3 = smov [#allocation6]   ;;  %p29_p5 = scmp.ge.s32.totalorder %s28_s29, 2 }
  0x27   : > { %366 = dma.vmem_to_smem (!%p364_p2), %s127_s26, 16, %s599_s3, [#allocation5]  }
  0x28   : > { %s31_s4 = sadd.s32 1, %s593_s15  ;;  %s137_s5 = sand.u32 1, %s577_s11  }
  0x29   : > { %s339_s6 = sshll.u32 %s593_s15, 2  ;;  %s845_s29 = smov (%p29_p5, %s28_s29), 0 }
  0x2a   : > { %827 = sst [smem:[#allocation13_spill]] %s845_s29  ;;  %s847_s4 = smov (!%p29_p5, %s31_s4), %s593_s15 }
  0x2b   : > { %s36_s7 = ssub.s32 %s589_s14, %s845_s29  ;;  %p33_p7 = scmp.ge.s32.totalorder %s847_s4, 2 }
  0x2c   : > { %s338_s8 = sshll.u32 %s137_s5, 4  ;;  %s146_s17 = sadd.s32 %s589_s14, %s339_s6 }
  0x2d   : > { %s849_s4 = smov (%p33_p7, %s847_s4), 0  ;;  %s340_s18 = sshll.u32 %s146_s17, 7 }
  0x2e   : > { %s141_s24 = scalar_lea.vmem [#allocation2], %s338_s8  ;;  %s35_s26 = ssub.s32 %s593_s15, %s849_s4 }
  0x2f   : > { %s149_s25 = sshll.u32 %s141_s24, 4  ;;  %s148_s19 = scalar_lea.hbm %s808_s0, %s340_s18  ;;  %s150_s25 = int_to_ptr.vmem [resolvable:$true] %s149_s25 }
  0x30   : > { %s37_s1 = sor.u32 %s36_s7, %s35_s26  ;;  %s828_s23 = sadd.s32 1, %s577_s11 }
  0x31   : > { %p38_p8 = scmp.eq.s32.totalorder %s37_s1, 0  ;;  %s138_s29 = scalar_lea.sflag [#allocation3], %s137_s5 }
  0x32   : > { %p471_p9 = pneg %p701_p1  ;;  %s482_s6 = scalar_lea.vmem %s150_s25, 256 }
  0x33   : > { %s727_s9 = scalar_select %p38_p8, %s577_s11, %s828_s23  }
  0x34   : > { %p483_p12 = scmp.ne.s32.totalorder %s150_s25, %s482_s6  ;;  %s600_s8 = smov [#allocation2]  }
  0x35   : > { %s487_s17 = sshll.u32 %s600_s8, 4  ;;  %s488_s17 = int_to_ptr.vmem [resolvable:$false] %s487_s17 }
  0x36   : > { %p485_p13 = pnand %p483_p12, %p471_p9  ;;  %s489_s24 = scalar_lea.vmem %s488_s17, 512 }
  0x37   : > { %p490_p2 = scmp.lt.s32.totalorder %s150_s25, %s488_s17  ;;  %p491_p4 = scmp.lt.s32.totalorder %s489_s24, %s482_s6 }
  0x38   : > { %p486_p0 = pneg %p485_p13 }
  0x39   : > { %p492_p6 = por %p491_p4, %p490_p2 }
  0x3b   : > { %p493_p10 = pnand %p492_p6, %p486_p0 }
  0x3d   : > { %496 = shalt.err (!%p493_p10)
}
  0x3e   : > { %s601_s1 = smov 256   ;;  %s602_s23 = smov 128  }
  0x3f   : > { %s603_s7 = smov 8   ;;  %p829_p11 = scmp.ne.s32.totalorder %s825_s27, 0 }
  0x40   : > { %370 = dma.hbm_to_vmem [thread:$0]  (!%p701_p1), %s148_s19, 256, %s150_s25, %s138_s29, %s601_s1, %s602_s23, %s603_s7  }
  0x41   : > { %161 = sbr.rel (%p829_p11) target bundleno = 121 (0x79), region = 28  ;;  %s736_s5 = sand.u32 (!%p829_p11), 1, %s573_s10  }
  0x42   : > { %s342_s18 = sshll.u32 (!%p829_p11), %s736_s5, 4  ;;  %s164_s26 = scalar_lea.sflag (!%p829_p11), [#allocation3], %s736_s5 }
  0x43   : > { %s167_s30 = scalar_lea.vmem (!%p829_p11), [#allocation2], %s342_s18  ;;  %p830_p5 = scmp.ne.s32.totalorder (!%p829_p11), %s820_s21, 0 }
  0x46   : > { %556 = dma.done.wait (%p830_p5), %s164_s26, 256  }
  0x47   : > { %558 = vsyncadd (%p830_p5), %s164_s26, 4294967040 }
  0x48   : > { %560 = dma.done.wait (%p671_p3), [#allocation5], 16  }
  0x49   : > { %562 = vsyncadd (%p671_p3), [#allocation5], 4294967280 }
  0x4a   : > { %176 = sfence }
  0x4b   : > { %s194_s19 = sld [smem:[#allocation6]]  ;;  %v193_v0 = vld [vmem:[%s167_s30] sm:$0xff]  ;;  %v346_v2 = vld [vmem:[%s167_s30 + $0x8] sm:$0xff]  ;;  %s351_s20 = sshll.u32 %s585_s13, 2  ;;  %vm203_vm0 = vcmask 130048  }
  0x4c   : > { %s345_s27 = sld [smem:[#allocation6 + $0x2]]  ;;  %s230_s21 = sadd.s32 %s581_s12, %s351_s20 }
  0x4d   : > { %s347_s28 = sld [smem:[#allocation6 + $0x1]]  ;;  %s192_s25 = scalar_lea.vmem [#allocation7], %s342_s18 }
  0x4e   : > { %s348_s29 = sld [smem:[#allocation6 + $0x3]]  ;;  %s233_s3 = sshll.u32 %s192_s25, 4  ;;  %s750_s3 = int_to_ptr.vmem [resolvable:$true] %s233_s3 }
  0x4f   : > { %s352_s6 = sshll.u32 %s230_s21, 7  ;;  %s219_s12 = scalar_lea.sflag [#allocation4], %s736_s5 }
  0x50   : > { %s755_s13 = scalar_lea.hbm %s810_s2, %s352_s6  ;;  %s497_s24 = scalar_lea.vmem %s750_s3, 256 }
  0x51   : > { %v195_v1 = vstv %s194_s19  ;;  %p498_p3 = scmp.ne.s32.totalorder %s750_s3, %s497_s24  ;;  %p831_p1 = scmp.ne.s32.totalorder %s821_s22, 0 }
  0x52   : > { %v196_v3 = vmul.f32 %v195_v1, %v193_v0  ;;  %v198_v4 = vstv %s345_s27  ;;  %s604_s1 = smov [#allocation7]  }
  0x53   : > { %v208_v5 = vstv %s347_s28  ;;  %p499_p7 = pnand %p498_p3, %p831_p1  ;;  %s501_s23 = sshll.u32 %s604_s1, 4  ;;  %s502_s23 = int_to_ptr.vmem [resolvable:$false] %s501_s23 }
  0x54   : > { %v199_v6 = vadd.f32 %v198_v4, %v196_v3  ;;  %v209_v7 = vmul.f32 %v346_v2, %v208_v5  ;;  %v211_v8 = vstv %s348_s29  ;;  %s503_s7 = scalar_lea.vmem %s502_s23, 512  ;;  %p504_p9 = scmp.lt.s32.totalorder %s750_s3, %s502_s23 }
  0x55   : > { %p500_p8 = pneg %p499_p7  ;;  %p505_p12 = scmp.lt.s32.totalorder %s503_s7, %s497_s24 }
  0x56   : > { %v200_v9 = vmul.f32 0.5, %v199_v6  ;;  %v212_v10 = vadd.f32 %v211_v8, %v209_v7 }
  0x57   : > { %p506_p13 = por %p505_p12, %p504_p9 }
  0x58   : > { %450 = vtanh.f32 %v200_v9  ;;  %v213_v11 = vmul.f32 0.5, %v212_v10 }
  0x59   : > { %p507_p0 = pnand %p506_p13, %p500_p8 }
  0x5a   : > { %452 = vtanh.f32 %v213_v11 }
  0x65   : > { %v451_v12 = vpop.eup %450 }
  0x66   : > { %v202_v13 = vmul.f32 0.05, %v451_v12 }
  0x67   : > { %v453_v14 = vpop.eup %452 }
  0x68   : > { %204 = vst.msk [vmem:[%s192_s25] sm:$0xff] %vm203_vm0, %v202_v13  ;;  %v215_v15 = vmul.f32 0.05, %v453_v14 }
  0x6a   : > { %349 = vst.msk [vmem:[%s192_s25 + $0x8] sm:$0xff] %vm203_vm0, %v215_v15 }
  0x6b   : > { %510 = shalt.err (!%p507_p0)
}
  0x6c   : > { %s511_s18 = scalar_lea.hbm %s755_s13, 256  ;;  %s515_s19 = scalar_lea.hbm %s810_s2, 1024 }
  0x6d   : > { %p512_p2 = scmp.ne.s32.totalorder %s755_s13, %s511_s18  ;;  %p516_p10 = scmp.lt.s32.totalorder %s755_s13, %s810_s2 }
  0x6e   : > { %p517_p11 = scmp.lt.s32.totalorder %s515_s19, %s511_s18 }
  0x6f   : > { %p513_p4 = pnand %p512_p2, %p831_p1 }
  0x70   : > { %p518_p5 = por %p517_p11, %p516_p10 }
  0x71   : > { %p514_p6 = pneg %p513_p4 }
  0x73   : > { %p519_p3 = pnand %p518_p5, %p514_p6 }
  0x75   : > { %522 = shalt.err (!%p519_p3)
}
  0x76   : > { %s605_s29 = smov 128   ;;  %s606_s20 = smov 256  }
  0x77   : > { %s607_s21 = smov 8  }
  0x78   : > { %361 = dma.vmem_to_hbm [thread:$0]  (%p831_p1), %s750_s3, 256, %s755_s13, %s219_s12, %s605_s29, %s606_s20, %s607_s21  }
  0x79 PF: > { %s832_s25 = sld [smem:[#allocation11_spill]]  ;;  %p378_p7 = scmp.ge.s32.totalorder %s597_s16, 2 }
  0x7a   : > { %s833_s6 = sld [smem:[#allocation12_spill]] }
  0x7f   : > { %s248_s8 = sand.u32 1, %s832_s25  }
  0x80   : > { %p834_p8 = scmp.ne.s32.totalorder %s833_s6, 0  ;;  %s249_s17 = scalar_lea.sflag [#allocation4], %s248_s8 }
  0x82   : > { %p372_p9 = pnand %p378_p7, %p834_p8 }
  0x84   : > { %p373_p12 = pneg %p372_p9 }
  0x86   : > { %564 = dma.done.wait (%p373_p12), %s249_s17, 256  }
  0x87   : > { %566 = vsyncadd (%p373_p12), %s249_s17, 4294967040  ;;  %s19_s16 = sadd.s32 1, %s597_s16   ;;  %s835_s22 = smov %s727_s9 }
  0x88   : > { %p16_p13 = scmp.ge.s32.totalorder %s19_s16, 6   ;;  %s836_s5 = sld [smem:[#allocation13_spill]] }
  0x89   : > { %s837_s9 = smov %s573_s10  ;;  %s838_s10 = smov %s577_s11 }
  0x8a   : > { %s839_s11 = smov %s835_s22  ;;  %s840_s12 = smov %s589_s14 }
  0x8b   : > { %s841_s13 = smov %s593_s15  ;;  %s843_s15 = smov %s849_s4 }
  0x8c   :  { %18 = sbr.rel (!%p16_p13) target bundleno = 10 (0xa), region = 80 }
  0x8e   : > { %s842_s14 = smov %s836_s5 }
  0x91   :  { %254 = vsyncpa [#allocation3], 1 }
  0x92   :  { %256 = vsyncpa [#allocation3 + $0x1], 1 }
  0x93   :  { %257 = vsyncpa [#allocation4], 1 }
  0x94   :  { %259 = vsyncpa [#allocation4 + $0x1], 1 }
  0x95   :  { %260 = vsyncpa [#allocation5], 1 }
  0x96   :  { %262 = vsyncpa [#allocation5 + $0x1], 1 }

// kernel: get_disp_forward.2
= control target key start
LH: loop header
LB: loop body
LE: loop exit
PB: predicated region body
PF: predicated region fallthrough
CT: control target
= control target key end

     0   :  { %s2586_s0 = inlined_call_operand.hbm [shape: f32[2,4,16,16], index: 0, kind: input, shape index: {}]   ;;  %s2587_s1 = inlined_call_operand.vmem [shape: f32[74], index: 1, kind: input, shape index: {}]   ;;  %s2588_s2 = inlined_call_operand.hbm [shape: f32[2,2,16,16], index: 2, kind: output, shape index: {0}]   ;;  %s2589_s3 = inlined_call_operand.vmem [shape: f32[2,2,2,1], index: 3, kind: output, shape index: {1}]   ;;  %s2590_s4 = inlined_call_operand.vmem [shape: f32[2,2,2,1], index: 4, kind: output, shape index: {2}]  }
   0x1   :  { %2618 = sst [smem:[#allocation32_spill]] %s2586_s0 }
   0x2   :  { %2619 = sst [smem:[#allocation33_spill]] %s2587_s1 }
   0x3   :  { %2620 = sst [smem:[#allocation34_spill]] %s2588_s2 }
   0x4   :  { %2621 = sst [smem:[#allocation35_spill]] %s2589_s3 }
   0x5   :  { %2622 = sst [smem:[#allocation36_spill]] %s2590_s4 }
   0x6   :  { %10 = vsyncpa [#allocation3], 0 }
   0x7   :  { %12 = vsyncpa [#allocation3 + $0x1], 0 }
   0x8   :  { %13 = vsyncpa [#allocation5], 0 }
   0x9   :  { %14 = vsyncpa [#allocation4], 0 }
   0xa   :  { %16 = vsyncpa [#allocation4 + $0x1], 0  ;;  %s1793_s15 = smov 0   ;;  %s1795_s16 = smov 0  }
   0xb   :  { %s1797_s17 = smov 0   ;;  %s1799_s18 = smov 0  }
   0xc   :  { %s1801_s19 = smov 0   ;;  %s1803_s20 = smov 0  }
   0xd   :  { %s1805_s21 = smov 0   ;;  %s1807_s22 = smov 0  }
   0xe   :  { %s1809_s23 = smov 0   ;;  %s1811_s24 = smov 0  }
   0xf   :  { %s1813_s25 = smov 0  }
  0x10 LB: > { %2623 = sst [smem:[#allocation11_spill]] %s1716_s15  ;;  %s1359_s26 = sadd.s32 4294967295, %s1756_s25   ;;  %s1756_s25 = sphi %s1813_s25, %s22_s25   ;;  %s1752_s24 = sphi %s1811_s24, %s2707_s24   ;;  %s1748_s23 = sphi %s1809_s23, %s2706_s23   ;;  %s1744_s22 = sphi %s1807_s22, %s2705_s22   ;;  %s1740_s21 = sphi %s1805_s21, %s2704_s21   ;;  %s1736_s20 = sphi %s1803_s20, %s2703_s20   ;;  %s1732_s19 = sphi %s1801_s19, %s2702_s19   ;;  %s1728_s18 = sphi %s1799_s18, %s2701_s18   ;;  %s1724_s17 = sphi %s1797_s17, %s2700_s17   ;;  %s1720_s16 = sphi %s1795_s16, %s2699_s16   ;;  %s1716_s15 = sphi %s1793_s15, %s2698_s15  }
  0x11   : > { %2624 = sst [smem:[#allocation12_spill]] %s1720_s16  ;;  %s1360_s27 = sadd.s32 4294967294, %s1756_s25  }
  0x12   : > { %2625 = sst [smem:[#allocation13_spill]] %s1724_s17  ;;  %p48_p0 = scmp.ne.s32.totalorder %s1736_s20, %s1732_s19 }
  0x13   : > { %2626 = sst [smem:[#allocation14_spill]] %s1732_s19  ;;  %p49_p1 = scmp.eq.s32.totalorder %s1756_s25, 0 }
  0x14   : > { %2627 = sst [smem:[#allocation15_spill]] %s1736_s20  ;;  %p54_p2 = scmp.ne.s32.totalorder %s1732_s19, %s1728_s18 }
  0x15   : > { %2628 = sst [smem:[#allocation16_spill]] %s1740_s21  ;;  %p1853_p3 = scmp.eq.s32.totalorder %s1359_s26, 0 }
  0x16   : > { %2629 = sst [smem:[#allocation17_spill]] %s1744_s22  ;;  %p1857_p4 = por %p49_p1, %p48_p0 }
  0x17   : > { %2630 = sst [smem:[#allocation18_spill]] %s1748_s23  ;;  %p100_p5 = scmp.ne.s32.totalorder %s1724_s17, %s1720_s16 }
  0x18   : > { %2631 = sst [smem:[#allocation19_spill]] %s1752_s24  ;;  %p1865_p6 = por %p1853_p3, %p54_p2 }
  0x19   : > { %2632 = sst [smem:[#allocation20_spill]] %s1756_s25  ;;  %p101_p7 = scmp.eq.s32.totalorder %s1359_s26, 3 }
  0x1a   : > { %s2635_s5 = scalar_select %p1865_p6, 1, 0 }
  0x1b   : > { %p106_p8 = scmp.ne.s32.totalorder %s1720_s16, %s1716_s15  ;;  %p107_p9 = scmp.eq.s32.totalorder %s1360_s27, 3 }
  0x1c   : > { %p1871_p10 = por %p101_p7, %p100_p5  ;;  %p1361_p11 = scmp.ge.s32.totalorder %s1756_s25, 1 }
  0x1d   : > { %p1876_p12 = por %p107_p9, %p106_p8  ;;  %p170_p13 = scmp.lt.s32.totalorder %s1756_s25, 5 }
  0x1e   : > { %s2636_s6 = scalar_select %p1871_p10, 1, 0 }
  0x1f   : > { %s2638_s7 = scalar_select %p1876_p12, 1, 0 }
  0x20   : > { %2637 = sst [smem:[#allocation21_spill]] %s2636_s6  ;;  %p1884_p0 = pnand %p1361_p11, %p170_p13 }
  0x21   : > { %2639 = sst [smem:[#allocation22_spill]] %s2638_s7  ;;  %p1490_p2 = scmp.lt.s32.totalorder %s1756_s25, 4 }
  0x22   : > { %s2640_s1 = sld [smem:[#allocation33_spill]]  ;;  %p1477_p1 = pneg %p1884_p0 }
  0x23   : > { %s2641_s11 = scalar_select %p1884_p0, 1, 0 }
  0x24   : > { %p1478_p5 = pnand %p1477_p1, %p1853_p3  ;;  %p1895_p7 = pnand %p1490_p2, %p1857_p4 }
  0x26   : > { %p1591_p9 = pneg %p1478_p5 }
  0x28   : > { %s183_s10 = sshll.u32 %s2640_s1, 4  ;;  %s184_s10 = int_to_ptr.vmem [resolvable:$true] %s183_s10 }
  0x29   : > { %s1589_s13 = scalar_lea.vmem %s184_s10, 16  ;;  %p1597_p13 = scmp.lt.s32.totalorder %s184_s10, %s184_s10 }
  0x2a   : > { %p1590_p8 = scmp.ne.s32.totalorder %s184_s10, %s1589_s13  ;;  %p1598_p10 = scmp.lt.s32.totalorder %s1589_s13, %s1589_s13 }
  0x2c   : > { %p1592_p12 = pnand %p1591_p9, %p1590_p8  ;;  %p1599_p6 = por %p1598_p10, %p1597_p13 }
  0x2e   : > { %p1593_p11 = pneg %p1592_p12 }
  0x30   : > { %p1600_p0 = pnand %p1599_p6, %p1593_p11 }
  0x32   : > { %1603 = shalt.err (!%p1600_p0)
}
  0x33   : > { %s1758_s14 = smov [#allocation6]   ;;  %s31_s18 = sadd.s32 1, %s1748_s23 }
  0x34   : > { %1480 = dma.vmem_to_smem (!%p1478_p5), %s184_s10, 16, %s1758_s14, [#allocation5]  }
  0x35   : > { %s34_s26 = sadd.s32 1, %s1752_s24  ;;  %p32_p4 = scmp.ge.s32.totalorder %s31_s18, 2 }
  0x36   : > { %s194_s27 = sand.u32 1, %s1736_s20   ;;  %s90_s30 = sadd.s32 1, %s1724_s17 }
  0x37   : > { %s1364_s8 = sshll.u32 %s194_s27, 6  ;;  %s2709_s18 = smov (%p32_p4, %s31_s18), 0 }
  0x38   : > { %2643 = sst [smem:[#allocation23_spill]] %s2709_s18  ;;  %s2711_s26 = smov (!%p32_p4, %s34_s26), %s1752_s24 }
  0x39   : > { %p36_p6 = scmp.ge.s32.totalorder %s2711_s26, 2  ;;  %s1468_s9 = sshll.u32 %s1752_s24, 10 }
  0x3a   : > { %s86_s13 = ssub.s32 %s1748_s23, %s2709_s18  ;;  %s198_s28 = scalar_lea.vmem [#allocation2], %s1364_s8 }
  0x3b   : > { %s205_s10 = sshll.u32 %s198_s28, 4  ;;  %s2713_s26 = smov (%p36_p6, %s2711_s26), 0  ;;  %s206_s10 = int_to_ptr.vmem [resolvable:$true] %s205_s10 }
  0x3c   : > { %2644 = sst [smem:[#allocation24_spill]] %s2713_s26  ;;  %s38_s15 = ssub.s32 %s1752_s24, %s2713_s26 }
  0x3d   : > { %s2645_s0 = sld [smem:[#allocation32_spill]]  ;;  %p39_p10 = scmp.eq.s32.totalorder %s38_s15, 0 }
  0x3e   : > { %s87_s25 = sor.u32 %s86_s13, %s38_s15  ;;  %s2646_s4 = sadd.s32 1, %s1736_s20 }
  0x3f   : > { %p88_p12 = scmp.eq.s32.totalorder %s87_s25, 0  ;;  %s195_s8 = scalar_lea.sflag [#allocation3], %s194_s27 }
  0x40   : > { %s1921_s3 = scalar_select %p39_p10, %s1736_s20, %s2646_s4  }
  0x41   : > { %s1924_s2 = scalar_select %p88_p12, %s1724_s17, %s90_s30  }
  0x42   : > { %2647 = sst [smem:[#allocation25_spill]] %s1921_s3  ;;  %p1606_p0 = pneg %p1895_p7 }
  0x43   : > { %s1914_s7 = scalar_lea.hbm %s2645_s0, %s1468_s9  ;;  %2648 = sst [smem:[#allocation26_spill]] %s1924_s2 }
  0x44   : > { %s1617_s28 = scalar_lea.vmem %s206_s10, 1024  ;;  %s1759_s1 = smov [#allocation2]  }
  0x45   : > { %p1618_p1 = scmp.ne.s32.totalorder %s206_s10, %s1617_s28  ;;  %s1622_s9 = sshll.u32 %s1759_s1, 4  ;;  %s1623_s9 = int_to_ptr.vmem [resolvable:$false] %s1622_s9 }
  0x46   : > { %s1624_s14 = scalar_lea.vmem %s1623_s9, 2048  ;;  %p1625_p8 = scmp.lt.s32.totalorder %s206_s10, %s1623_s9 }
  0x47   : > { %p1620_p2 = pnand %p1618_p1, %p1606_p0  ;;  %p1626_p9 = scmp.lt.s32.totalorder %s1624_s14, %s1617_s28 }
  0x49   : > { %p1621_p5 = pneg %p1620_p2  ;;  %p1627_p11 = por %p1626_p9, %p1625_p8 }
  0x4b   : > { %p1628_p13 = pnand %p1627_p11, %p1621_p5 }
  0x4d   : > { %1631 = shalt.err (!%p1628_p13)
}
  0x4e   : > { %s1760_s4 = smov 128   ;;  %s1761_s15 = smov 8  }
  0x4f   : > { %1484 = dma.hbm_to_vmem [thread:$0]  (!%p1895_p7), %s1914_s7, 1024, %s206_s10, %s195_s8, %s1760_s4, %s1760_s4, %s1761_s15  }
  0x50   : > { %p2649_p4 = scmp.ne.s32.totalorder %s2641_s11, 0 }
  0x52   : > { %217 = sbr.rel (%p2649_p4) target bundleno = 470 (0x1d6), region = 28 }
  0x57   : > { %s219_s25 = sand.u32 1, %s1732_s19   ;;  %p2650_p6 = scmp.ne.s32.totalorder %s2635_s5, 0 }
  0x58   : > { %s1368_s27 = sshll.u32 %s219_s25, 6  ;;  %s220_s30 = scalar_lea.sflag [#allocation3], %s219_s25 }
  0x59   : > { %s1934_s13 = scalar_lea.vmem [#allocation2], %s1368_s27 }
  0x5a   : > { %1703 = dma.done.wait (%p2650_p6), %s220_s30, 1024  }
  0x5b   : > { %1705 = vsyncadd (%p2650_p6), %s220_s30, 4294966272 }
  0x5c   : > { %1707 = dma.done.wait (%p1853_p3), [#allocation5], 16  }
  0x5d   : > { %1709 = vsyncadd (%p1853_p3), [#allocation5], 4294967280 }
  0x5e   : > { %232 = sfence }
  0x5f   : > { %s1375_s7 = sshll.u32 %s1740_s21, 3  ;;  %p286_p7 = scmp.gt.s32.totalorder %s1740_s21, 0  ;;  %vm314_vm0 = vcmask 1040384   ;;  %vm351_vm1 = vcmask 1046528   ;;  %vm374_vm2 = vcmask 1045504   ;;  %vm325_vm3 = vcmask 7168  }
  0x60   : > { %s1376_s11 = sadd.s32 4294967295, %s1375_s7  ;;  %s1947_s12 = scalar_lea.vmem %s1934_s13, %s1375_s7 [#allocation2]  ;;  %vm334_vm4 = vcmask 121856   ;;  %vm1077_vm5 = vcmask 130048  }
  0x61   : > { %s287_s10 = scalar_select %p286_p7, 1, 0  ;;  %v299_v0 = vld [vmem:[%s1947_s12] sm:$0xff]  ;;  %v1395_v6 = vld [vmem:[%s1947_s12 + $0x10] sm:$0xff] }
  0x62   : > { %p294_p10 = scmp.gt.s32.totalorder %s1376_s11, 0  ;;  %s289_s8 = sadd.s32 8, %s1375_s7  ;;  %v309_v2 = vrot.slane %v299_v0, 7  ;;  %v507_v14 = vrot.slane %v1395_v6, 7  ;;  %v1417_v25 = vld [vmem:[%s1947_s12 + $0x20] sm:$0xff]  ;;  %v1439_v53 = vld [vmem:[%s1947_s12 + $0x30] sm:$0xff] }
  0x63   : > { %s288_s5 = scvt.s32.f32 %s287_s10  ;;  %p290_p3 = scmp.lt.s32.totalorder %s289_s8, 16  ;;  %v700_v32 = vrot.slane %v1417_v25, 7  ;;  %v893_v0 = vrot.slane %v1439_v53, 7 }
  0x64   : > { %s2715_s11 = smov (!%p294_p10, %s1376_s11), 0  ;;  %p296_p12 = scmp.lt.s32.totalorder %s289_s8, 15 }
  0x65   : > { %v1950_v1 = vstv %s288_s5  ;;  %s1953_s29 = scalar_lea.vmem %s1934_s13, %s2715_s11 [#allocation2]  ;;  %s1955_s28 = sld [smem:[#allocation6 + $0x4]] }
  0x66   : > { %v301_v3 = vld [vmem:[%s1953_s29] sm:$0x1]  ;;  %s291_s1 = scalar_select %p290_p3, 1, 0  ;;  %v1396_v7 = vld [vmem:[%s1953_s29 + $0x10] sm:$0x1] }
  0x67   : > { %v303_v4 = vmul.f32 %v1950_v1, %v301_v3  ;;  %s2717_s8 = smov (!%p296_p12, %s289_s8), 15  ;;  %s1959_s14 = sld [smem:[#allocation6 + $0x28]]  ;;  %v501_v12 = vmul.f32 %v1396_v7, %v1950_v1  ;;  %v1418_v27 = vld [vmem:[%s1953_s29 + $0x20] sm:$0x1]  ;;  %v1440_v57 = vld [vmem:[%s1953_s29 + $0x30] sm:$0x1] }
  0x68   : > { %s292_s9 = scvt.s32.f32 %s291_s1  ;;  %s1965_s4 = scalar_lea.vmem %s1934_s13, %s2717_s8 [#allocation2]  ;;  %v694_v33 = vmul.f32 %v1418_v27, %v1950_v1  ;;  %v887_v6 = vmul.f32 %v1440_v57, %v1950_v1 }
  0x69   : > { %v1962_v5 = vsel %vm314_vm0, %v303_v4, %v309_v2  ;;  %s1762_s15 = smov 1   ;;  %v305_v8 = vld [vmem:[%s1965_s4] sm:$0x1]  ;;  %s1763_s25 = smov 127   ;;  %v1397_v11 = vld [vmem:[%s1965_s4 + $0x10] sm:$0x1]  ;;  %v1991_v21 = vsel %vm314_vm0, %v501_v12, %v507_v14 }
  0x6a   : > { %319 = vrot.lane.b32.xlu0 %v1962_v5, %s1762_s15  ;;  %v306_v9 = vstv %s292_s9  ;;  %328 = vrot.lane.b32.xlu1 %v1962_v5, %s1763_s25  ;;  %s1975_s27 = sld [smem:[#allocation6 + $0xd]]  ;;  %v1419_v18 = vld [vmem:[%s1965_s4 + $0x20] sm:$0x1]  ;;  %v2018_v48 = vsel %vm314_vm0, %v694_v33, %v700_v32 }
  0x6b   : > { %v307_v10 = vmul.f32 %v306_v9, %v305_v8  ;;  %v505_v13 = vmul.f32 %v1397_v11, %v306_v9  ;;  %s1978_s30 = sld [smem:[#allocation6 + $0x31]]  ;;  %v400_v16 = vstv %s1955_s28  ;;  %v698_v26 = vmul.f32 %v1419_v18, %v306_v9  ;;  %v1441_v37 = vld [vmem:[%s1965_s4 + $0x30] sm:$0x1] }
  0x6c   : > { %s1980_s13 = sld [smem:[#allocation6 + $0x7]]  ;;  %v401_v22 = vmul.f32 %v400_v16, %v1962_v5  ;;  %v891_v49 = vmul.f32 %v1441_v37, %v306_v9 }
  0x6d   : > { %v312_v15 = vrot.slane %v307_v10, 7  ;;  %s1983_s7 = sld [smem:[#allocation6 + $0x2b]]  ;;  %v510_v17 = vrot.slane %v505_v13, 7  ;;  %v411_v20 = vstv %s1959_s14  ;;  %v703_v36 = vrot.slane %v698_v26, 7 }
  0x6e   : > { %s1993_s11 = sld [smem:[#allocation6 + $0x10]]  ;;  %v412_v28 = vmul.f32 %v411_v20, %v1962_v5  ;;  %v405_v38 = vrot.slane %v401_v22, 1  ;;  %v896_v4 = vrot.slane %v891_v49, 7 }
  0x6f   : > { %v316_v19 = vsel %vm314_vm0, %v309_v2, %v312_v15  ;;  %v513_v24 = vsel %vm314_vm0, %v507_v14, %v510_v17  ;;  %s1997_s10 = sld [smem:[#allocation6 + $0x34]]  ;;  %v706_v52 = vsel %vm314_vm0, %v700_v32, %v703_v36  ;;  %v2060_v17 = vsel %vm314_vm0, %v887_v6, %v893_v0 }
  0x70   : > { %321 = vrot.lane.b32.xlu0 %v316_v19, %s1762_s15  ;;  %330 = vrot.lane.b32.xlu1 %v316_v19, %s1763_s25  ;;  %v402_v23 = vmul.f32 %v400_v16, %v316_v19  ;;  %v413_v29 = vmul.f32 %v411_v20, %v316_v19  ;;  %v593_v30 = vstv %s1975_s27  ;;  %v416_v45 = vrot.slane %v412_v28, 1  ;;  %s2034_s12 = sld [smem:[#allocation6 + $0x16]] }
  0x71   : > { %v604_v31 = vstv %s1978_s30  ;;  %v594_v40 = vmul.f32 %v593_v30, %v1991_v21  ;;  %v595_v41 = vmul.f32 %v593_v30, %v513_v24  ;;  %s2038_s5 = sld [smem:[#allocation6 + $0x3a]]  ;;  %v899_v16 = vsel %vm314_vm0, %v893_v0, %v896_v4 }
  0x72   : > { %v422_v34 = vstv %s1980_s13  ;;  %v406_v35 = vrot.slane %v402_v23, 1  ;;  %v417_v42 = vrot.slane %v413_v29, 1  ;;  %v605_v43 = vmul.f32 %v604_v31, %v1991_v21  ;;  %s2043_s8 = sld [smem:[#allocation6 + $0x19]] }
  0x73   : > { %v433_v39 = vstv %s1983_s7  ;;  %v606_v44 = vmul.f32 %v604_v31, %v513_v24  ;;  %v424_v46 = vmul.f32 %v422_v34, %v316_v19  ;;  %v598_v55 = vrot.slane %v594_v40, 1  ;;  %s2048_s29 = sld [smem:[#allocation6 + $0x3d]] }
  0x74   : > { %518 = vrot.lane.b32.xlu1 %v513_v24, %s1762_s15  ;;  %516 = vrot.lane.b32.xlu0 %v1991_v21, %s1762_s15  ;;  %v615_v47 = vstv %s1993_s11  ;;  %v435_v50 = vmul.f32 %v433_v39, %v316_v19  ;;  %v2024_v54 = vsel %vm351_vm1, %v405_v38, %v406_v35  ;;  %v599_v56 = vrot.slane %v595_v41, 1  ;;  %s1450_s28 = sld [smem:[#allocation6 + $0x1f]] }
  0x75   : > { %v626_v51 = vstv %s1997_s10  ;;  %v609_v58 = vrot.slane %v605_v43, 1  ;;  %v610_v59 = vrot.slane %v606_v44, 1  ;;  %v617_v60 = vmul.f32 %v615_v47, %v513_v24  ;;  %s1451_s1 = sld [smem:[#allocation6 + $0x43]] }
  0x76   : > { %v2028_v61 = vsel %vm351_vm1, %v416_v45, %v417_v42  ;;  %v428_v62 = vrot.slane %v424_v46, 2  ;;  %v628_v63 = vmul.f32 %v626_v51, %v513_v24  ;;  %v423_v2 = vmul.f32 %v422_v34, %v1962_v5  ;;  %s1452_s9 = sld [smem:[#allocation6 + $0x22]] }
  0x77   : > { %v439_v3 = vrot.slane %v435_v50, 2  ;;  %v434_v7 = vmul.f32 %v433_v39, %v1962_v5  ;;  %v2041_v9 = vsel %vm351_vm1, %v598_v55, %v599_v56  ;;  %v621_v10 = vrot.slane %v617_v60, 2  ;;  %s1453_s14 = sld [smem:[#allocation6 + $0x46]] }
  0x78   : > { %526 = vrot.lane.b32.xlu1 %v513_v24, %s1763_s25  ;;  %524 = vrot.lane.b32.xlu0 %v1991_v21, %s1763_s25  ;;  %v427_v8 = vrot.slane %v423_v2, 2  ;;  %v2046_v12 = vsel %vm351_vm1, %v609_v58, %v610_v59  ;;  %v632_v13 = vrot.slane %v628_v63, 2  ;;  %v616_v14 = vmul.f32 %v615_v47, %v1991_v21  ;;  %s2113_s4 = sld [smem:[#allocation6]] }
  0x79   : > { %v438_v11 = vrot.slane %v434_v7, 2  ;;  %v627_v15 = vmul.f32 %v626_v51, %v1991_v21  ;;  %v786_v24 = vstv %s2034_s12  ;;  %v797_v25 = vstv %s2038_s5  ;;  %s2119_s27 = sld [smem:[#allocation6 + $0x27]] }
  0x7a   : > { %v2054_v1 = vsel %vm374_vm2, %v427_v8, %v428_v62  ;;  %v620_v19 = vrot.slane %v616_v14, 2  ;;  %v808_v26 = vstv %s2043_s8  ;;  %v819_v27 = vstv %s2048_s29  ;;  %s2121_s30 = sld [smem:[#allocation6 + $0x6]] }
  0x7b   : > { %v2063_v18 = vsel %vm374_vm2, %v438_v11, %v439_v3  ;;  %v631_v20 = vrot.slane %v627_v15, 2  ;;  %v788_v28 = vmul.f32 %v786_v24, %v706_v52  ;;  %v799_v29 = vmul.f32 %v797_v25, %v706_v52  ;;  %s2123_s13 = sld [smem:[#allocation6 + $0x2a]] }
  0x7c   : > { %711 = vrot.lane.b32.xlu1 %v706_v52, %s1762_s15  ;;  %709 = vrot.lane.b32.xlu0 %v2018_v48, %s1762_s15  ;;  %v2069_v22 = vsel %vm374_vm2, %v620_v19, %v621_v10  ;;  %v810_v30 = vmul.f32 %v808_v26, %v706_v52  ;;  %v821_v31 = vmul.f32 %v819_v27, %v706_v52  ;;  %v979_v49 = vstv %s1450_s28  ;;  %s2125_s7 = sld [smem:[#allocation6 + $0x1]] }
  0x7d   : > { %v2072_v23 = vsel %vm374_vm2, %v631_v20, %v632_v13  ;;  %v792_v32 = vrot.slane %v788_v28, 1  ;;  %v803_v33 = vrot.slane %v799_v29, 1  ;;  %v787_v34 = vmul.f32 %v786_v24, %v2018_v48  ;;  %s2127_s11 = sld [smem:[#allocation6 + $0x25]] }
  0x7e   : > { %v798_v35 = vmul.f32 %v797_v25, %v2018_v48  ;;  %v814_v36 = vrot.slane %v810_v30, 2  ;;  %v825_v37 = vrot.slane %v821_v31, 2  ;;  %v809_v38 = vmul.f32 %v808_v26, %v2018_v48  ;;  %s2129_s10 = sld [smem:[#allocation6 + $0x2]] }
  0x7f   : > { %v820_v39 = vmul.f32 %v819_v27, %v2018_v48  ;;  %v791_v40 = vrot.slane %v787_v34, 1  ;;  %v990_v50 = vstv %s1451_s1  ;;  %v1001_v51 = vstv %s1452_s9  ;;  %s2131_s12 = sld [smem:[#allocation6 + $0x26]] }
  0x80   : > { %719 = vrot.lane.b32.xlu1 %v706_v52, %s1763_s25  ;;  %717 = vrot.lane.b32.xlu0 %v2018_v48, %s1763_s25  ;;  %v802_v41 = vrot.slane %v798_v35, 1  ;;  %v813_v42 = vrot.slane %v809_v38, 2  ;;  %v981_v52 = vmul.f32 %v979_v49, %v899_v16  ;;  %v1012_v53 = vstv %s1453_s14  ;;  %s2133_s5 = sld [smem:[#allocation6 + $0x5]] }
  0x81   : > { %v824_v43 = vrot.slane %v820_v39, 2  ;;  %v2086_v44 = vsel %vm351_vm1, %v791_v40, %v792_v32  ;;  %v992_v55 = vmul.f32 %v990_v50, %v899_v16  ;;  %v1003_v56 = vmul.f32 %v1001_v51, %v899_v16  ;;  %s2135_s8 = sld [smem:[#allocation6 + $0x29]] }
  0x82   : > { %v2089_v45 = vsel %vm351_vm1, %v802_v41, %v803_v33  ;;  %v2092_v46 = vsel %vm374_vm2, %v813_v42, %v814_v36  ;;  %v1014_v57 = vmul.f32 %v1012_v53, %v899_v16  ;;  %v985_v58 = vrot.slane %v981_v52, 1  ;;  %s2137_s29 = sld [smem:[#allocation6 + $0x8]] }
  0x83   : > { %v2095_v47 = vsel %vm374_vm2, %v824_v43, %v825_v37  ;;  %v980_v59 = vmul.f32 %v979_v49, %v2060_v17  ;;  %v991_v60 = vmul.f32 %v990_v50, %v2060_v17  ;;  %v996_v62 = vrot.slane %v992_v55, 1  ;;  %s2139_s28 = sld [smem:[#allocation6 + $0x2c]] }
  0x84   : > { %904 = vrot.lane.b32.xlu1 %v899_v16, %s1762_s15  ;;  %902 = vrot.lane.b32.xlu0 %v2060_v17, %s1762_s15  ;;  %v1007_v63 = vrot.slane %v1003_v56, 2  ;;  %v1002_v2 = vmul.f32 %v1001_v51, %v2060_v17  ;;  %v1018_v4 = vrot.slane %v1014_v57, 2  ;;  %v1013_v6 = vmul.f32 %v1012_v53, %v2060_v17  ;;  %s2115_s15 = sld [smem:[#allocation6 + $0x24]] }
  0x85   : > { %v984_v0 = vrot.slane %v980_v59, 1  ;;  %v995_v3 = vrot.slane %v991_v60, 1  ;;  %s2141_s1 = sld [smem:[#allocation6 + $0xc]]  ;;  %v392_v15 = vstv %s2125_s7  ;;  %v338_v19 = vstv %s2113_s4 }
  0x86   : > { %v1006_v8 = vrot.slane %v1002_v2, 2  ;;  %v1017_v11 = vrot.slane %v1013_v6, 2  ;;  %s2143_s9 = sld [smem:[#allocation6 + $0x30]]  ;;  %v358_v25 = vstv %s2119_s27  ;;  %v369_v26 = vstv %s2121_s30 }
  0x87   : > { %v2102_v7 = vsel %vm351_vm1, %v984_v0, %v985_v58  ;;  %v2105_v10 = vsel %vm351_vm1, %v995_v3, %v996_v62  ;;  %s2145_s14 = sld [smem:[#allocation6 + $0xf]]  ;;  %v381_v27 = vstv %s2123_s13  ;;  %v2194_v28 = vmul.f32 %v392_v15, %v1962_v5 }
  0x88   : > { %912 = vrot.lane.b32.xlu1 %v899_v16, %s1763_s25  ;;  %910 = vrot.lane.b32.xlu0 %v2060_v17, %s1763_s25  ;;  %v2108_v13 = vsel %vm374_vm2, %v1006_v8, %v1007_v63  ;;  %v2111_v14 = vsel %vm374_vm2, %v1017_v11, %v1018_v4  ;;  %s2117_s25 = sld [smem:[#allocation6 + $0x3]]  ;;  %v396_v16 = vstv %s2127_s11  ;;  %v444_v30 = vstv %s2129_s10 }
  0x89   : > { %s2147_s0 = sld [smem:[#allocation6 + $0x33]]  ;;  %v2199_v29 = vmul.f32 %v396_v16, %v1962_v5  ;;  %v448_v31 = vstv %s2131_s12  ;;  %v452_v32 = vstv %s2133_s5  ;;  %v463_v33 = vstv %s2135_s8 }
  0x8a   : > { %s2149_s26 = sld [smem:[#allocation6 + $0x9]]  ;;  %v342_v20 = vstv %s2115_s15  ;;  %v474_v34 = vstv %s2137_s29  ;;  %v485_v35 = vstv %s2139_s28 }
  0x8b   : > { %s2151_s18 = sld [smem:[#allocation6 + $0x2d]]  ;;  %v541_v36 = vstv %s2141_s1 }
  0x8c   : > { %s2153_s24 = sld [smem:[#allocation6 + $0xe]]  ;;  %v552_v38 = vstv %s2143_s9 }
  0x8d   : > { %s2155_s23 = sld [smem:[#allocation6 + $0x32]]  ;;  %v563_v5 = vstv %s2145_s14 }
  0x8e   : > { %s2157_s3 = sld [smem:[#allocation6 + $0x11]]  ;;  %v346_v24 = vstv %s2117_s25 }
  0x8f   : > { %s2159_s20 = sld [smem:[#allocation6 + $0x35]]  ;;  %v574_v42 = vstv %s2147_s0 }
  0x90   : > { %s2161_s19 = sld [smem:[#allocation6 + $0xa]]  ;;  %v533_v43 = vstv %s2149_s26 }
  0x91   : > { %s2163_s2 = sld [smem:[#allocation6 + $0x2e]]  ;;  %v537_v49 = vstv %s2151_s18 }
  0x92   : > { %s2165_s17 = sld [smem:[#allocation6 + $0xb]]  ;;  %v645_v50 = vstv %s2153_s24 }
  0x93   : > { %2651 = sst [smem:[#allocation27_spill]] %s2155_s23 }
  0x94   : > { %2652 = sst [smem:[#allocation28_spill]] %s2157_s3 }
  0x95   : > { %2653 = sst [smem:[#allocation29_spill]] %s2159_s20 }
  0x96   : > { %s2167_s6 = sld [smem:[#allocation6 + $0x2f]]  ;;  %v585_v39 = vstv %s2161_s19 }
  0x97   : > { %s2169_s21 = sld [smem:[#allocation6 + $0x15]]  ;;  %v589_v40 = vstv %s2163_s2  ;;  %v2223_v56 = vmul.f32 %v585_v39, %v1991_v21 }
  0x98   : > { %s2171_s22 = sld [smem:[#allocation6 + $0x39]]  ;;  %v2226_v57 = vmul.f32 %v589_v40, %v1991_v21 }
  0x99   : > { %s2173_s16 = sld [smem:[#allocation6 + $0x18]] }
  0x9a   : > { %s2175_s20 = sld [smem:[#allocation6 + $0x3c]] }
  0x9b   : > { %s2177_s3 = sld [smem:[#allocation6 + $0x12]] }
  0x9c   : > { %2654 = sst [smem:[#allocation30_spill]] %s2167_s6 }
  0x9d   : > { %s2180_s23 = sld [smem:[#allocation6 + $0x36]] }
  0x9e   : > { %s2183_s6 = sld [smem:[#allocation6 + $0x17]] }
  0x9f   : > { %s2196_s7 = sld [smem:[#allocation6 + $0x1a]] }
  0xa0   : > { %2655 = sst [smem:[#allocation31_spill]] %s2175_s20 }
  0xa1   : > { %s2188_s20 = sld [smem:[#allocation6 + $0x3b]] }
  0xa2   : > { %s2204_s4 = sld [smem:[#allocation6 + $0x13]] }
  0xa3   : > { %s2656_s25 = sld [smem:[#allocation27_spill]] }
  0xa4   : > { %s2657_s27 = sld [smem:[#allocation28_spill]] }
  0xa5   : > { %s2658_s30 = sld [smem:[#allocation29_spill]] }
  0xa6   : > { %s2659_s13 = sld [smem:[#allocation30_spill]] }
  0xa7   : > { %s2660_s11 = sld [smem:[#allocation31_spill]] }
  0xa8   : > { %s2236_s2 = sld [smem:[#allocation6 + $0x3e]] }
  0xa9   : > { %s2242_s19 = sld [smem:[#allocation6 + $0x37]] }
  0xaa   : > { %s2292_s15 = sld [smem:[#allocation6 + $0x14]] }
  0xab   : > { %s2298_s10 = sld [smem:[#allocation6 + $0x38]] }
  0xac   : > { %s2304_s12 = sld [smem:[#allocation6 + $0x1e]] }
  0xad   : > { %s2306_s5 = sld [smem:[#allocation6 + $0x42]] }
  0xae   : > { %s2312_s8 = sld [smem:[#allocation6 + $0x21]] }
  0xaf   : > { %s2366_s0 = sld [smem:[#allocation6 + $0x45]] }
  0xb0   : > { %s2378_s24 = sld [smem:[#allocation6 + $0x3f]] }
  0xb1   : > { %s2392_s18 = sld [smem:[#allocation6 + $0x1c]] }
  0xb2   : > { %s2489_s26 = sld [smem:[#allocation6 + $0x48]] }
  0xb3   : > { %s2685_s29 = sld [smem:[#allocation12_spill]] }
  0xb4   : > { %s1461_s28 = sld [smem:[#allocation6 + $0x49]] }
  0xb5   : > { %s2686_s14 = sld [smem:[#allocation17_spill]] }
  0xb9   : > { %s246_s1 = sand.u32 1, %s2685_s29  }
  0xba   : > { %s1370_s9 = sshll.u32 %s246_s1, 4 }
  0xdc   : > { %v320_v37 = vpop.permute.xlu0 %319  ;;  %v329_v41 = vpop.permute.xlu1 %328 }
  0xdd   : > { %v326_v51 = vsel %vm325_vm3, 0.0, %v320_v37  ;;  %v778_v37 = vstv %s2204_s4  ;;  %v335_v0 = vsel %vm334_vm4, %v329_v41, 0.0  ;;  %s248_s4 = scalar_lea.vmem [#allocation7], %s1370_s9 }
  0xde   : > { %v347_v2 = vmul.f32 %v346_v24, %v326_v51  ;;  %v359_v3 = vmul.f32 %v358_v25, %v326_v51  ;;  %v370_v39 = vmul.f32 %v369_v26, %v326_v51  ;;  %v382_v40 = vmul.f32 %v381_v27, %v326_v51 }
  0xdf   : > { %v339_v15 = vmul.f32 %v338_v19, %v326_v51  ;;  %v343_v41 = vmul.f32 %v342_v20, %v326_v51  ;;  %v871_v51 = vstv %s2236_s2 }
  0xe0   : > { %v352_v16 = vrot.slane %v347_v2, 1  ;;  %v363_v21 = vrot.slane %v359_v3, 1  ;;  %v375_v52 = vrot.slane %v370_v39, 2 }
  0xe2   : > { %v322_v8 = vpop.permute.xlu0 %321  ;;  %v331_v11 = vpop.permute.xlu1 %330 }
  0xe3   : > { %v327_v63 = vsel %vm325_vm3, 0.0, %v322_v8  ;;  %v336_v59 = vsel %vm334_vm4, %v331_v11, 0.0 }
  0xe4   : > { %v348_v4 = vmul.f32 %v346_v24, %v327_v63  ;;  %v360_v6 = vmul.f32 %v358_v25, %v327_v63  ;;  %v371_v62 = vmul.f32 %v369_v26, %v327_v63  ;;  %v383_v60 = vmul.f32 %v381_v27, %v327_v63 }
  0xe5   : > { %v386_v24 = vrot.slane %v382_v40, 2  ;;  %v453_v25 = vmul.f32 %v452_v32, %v335_v0  ;;  %v464_v27 = vmul.f32 %v463_v33, %v335_v0  ;;  %v454_v63 = vmul.f32 %v452_v32, %v336_v59 }
  0xe6   : > { %v353_v58 = vrot.slane %v348_v4, 1  ;;  %v364_v55 = vrot.slane %v360_v6, 1  ;;  %v376_v53 = vrot.slane %v371_v62, 2  ;;  %v387_v8 = vrot.slane %v383_v60, 2  ;;  %v519_v20 = vpop.permute.xlu1 %518 }
  0xe7   : > { %v465_v60 = vmul.f32 %v463_v33, %v336_v59  ;;  %v782_v6 = vstv %s2242_s19  ;;  %v486_v33 = vmul.f32 %v485_v35, %v335_v0 }
  0xe8   : > { %v354_v26 = vsel %vm351_vm1, %v352_v16, %v353_v58  ;;  %v365_v19 = vsel %vm351_vm1, %v363_v21, %v364_v55  ;;  %v377_v3 = vsel %vm374_vm2, %v375_v52, %v376_v53  ;;  %v388_v4 = vsel %vm374_vm2, %v386_v24, %v387_v8  ;;  %v517_v58 = vpop.permute.xlu0 %516 }
  0xe9   : > { %v356_v2 = vadd.f32 %v354_v26, %v339_v15  ;;  %v367_v62 = vadd.f32 %v365_v19, %v343_v41  ;;  %v2263_v55 = vmul.f32 %v778_v37, %v2018_v48  ;;  %v475_v15 = vmul.f32 %v474_v34, %v335_v0 }
  0xea   : > { %v457_v52 = vrot.slane %v453_v25, 1  ;;  %v468_v53 = vrot.slane %v464_v27, 1  ;;  %v458_v16 = vrot.slane %v454_v63, 1  ;;  %v523_v21 = vsel %vm325_vm3, 0.0, %v519_v20  ;;  %v527_v20 = vpop.permute.xlu1 %526 }
  0xeb   : > { %v379_v32 = vadd.f32 %v377_v3, %v356_v2  ;;  %v390_v11 = vadd.f32 %v388_v4, %v367_v62  ;;  %v469_v40 = vrot.slane %v465_v60, 1  ;;  %v522_v8 = vsel %vm325_vm3, 0.0, %v517_v58 }
  0xec   : > { %v445_v41 = vmul.f32 %v444_v30, %v335_v0  ;;  %v449_v24 = vmul.f32 %v448_v31, %v335_v0  ;;  %v476_v26 = vmul.f32 %v474_v34, %v336_v59  ;;  %v487_v25 = vmul.f32 %v485_v35, %v336_v59 }
  0xed   : > { %v394_v37 = vadd.f32 %v2194_v28, %v379_v32  ;;  %v398_v39 = vadd.f32 %v2199_v29, %v390_v11  ;;  %v543_v28 = vmul.f32 %v541_v36, %v523_v21  ;;  %v554_v29 = vmul.f32 %v552_v38, %v523_v21  ;;  %v525_v11 = vpop.permute.xlu0 %524 }
  0xee   : > { %v479_v63 = vrot.slane %v475_v15, 2  ;;  %v490_v2 = vrot.slane %v486_v33, 2  ;;  %v542_v30 = vmul.f32 %v541_v36, %v522_v8  ;;  %v553_v31 = vmul.f32 %v552_v38, %v522_v8 }
  0xef   : > { %v409_v19 = vadd.f32 %v2024_v54, %v394_v37  ;;  %v420_v27 = vadd.f32 %v2028_v61, %v398_v39  ;;  %v459_v35 = vsel %vm351_vm1, %v457_v52, %v458_v16  ;;  %v470_v61 = vsel %vm351_vm1, %v468_v53, %v469_v40 }
  0xf0   : > { %v480_v59 = vrot.slane %v476_v26, 2  ;;  %v491_v0 = vrot.slane %v487_v25, 2  ;;  %v565_v36 = vmul.f32 %v563_v5, %v523_v21  ;;  %v576_v38 = vmul.f32 %v574_v42, %v523_v21 }
  0xf1   : > { %v431_v34 = vadd.f32 %v2054_v1, %v409_v19  ;;  %v442_v54 = vadd.f32 %v2063_v18, %v420_v27  ;;  %v547_v62 = vrot.slane %v543_v28, 1  ;;  %v558_v60 = vrot.slane %v554_v29, 1 }
  0xf2   : > { %v546_v3 = vrot.slane %v542_v30, 1  ;;  %v557_v4 = vrot.slane %v553_v31, 1  ;;  %v564_v58 = vmul.f32 %v563_v5, %v522_v8  ;;  %v575_v32 = vmul.f32 %v574_v42, %v522_v8 }
  0xf3   : > { %v446_v1 = vadd.f32 %v445_v41, %v431_v34  ;;  %v450_v18 = vadd.f32 %v449_v24, %v442_v54  ;;  %v534_v52 = vmul.f32 %v533_v43, %v522_v8  ;;  %v538_v53 = vmul.f32 %v537_v49, %v522_v8 }
  0xf4   : > { %v481_v16 = vsel %vm374_vm2, %v479_v63, %v480_v59  ;;  %v492_v21 = vsel %vm374_vm2, %v490_v2, %v491_v0  ;;  %v569_v5 = vrot.slane %v565_v36, 2  ;;  %v531_v42 = vsel %vm334_vm4, %v527_v20, 0.0 }
  0xf5   : > { %v461_v15 = vadd.f32 %v459_v35, %v446_v1  ;;  %v472_v33 = vadd.f32 %v470_v61, %v450_v18  ;;  %v580_v40 = vrot.slane %v576_v38, 2  ;;  %v530_v43 = vsel %vm334_vm4, %v525_v11, 0.0  ;;  %v712_v61 = vpop.permute.xlu1 %711 }
  0xf6   : > { %v548_v49 = vsel %vm351_vm1, %v546_v3, %v547_v62  ;;  %v559_v8 = vsel %vm351_vm1, %v557_v4, %v558_v60  ;;  %v568_v41 = vrot.slane %v564_v58, 2  ;;  %v579_v24 = vrot.slane %v575_v32, 2 }
  0xf7   : > { %v483_v37 = vadd.f32 %v481_v16, %v461_v15  ;;  %v494_v39 = vadd.f32 %v492_v21, %v472_v33  ;;  %v647_v19 = vmul.f32 %v645_v50, %v531_v42  ;;  %v2661_v27 = vstv %s2656_s25  ;;  %s2688_s25 = sld [smem:[#allocation21_spill]] }
  0xf8   : > { %v658_v28 = vmul.f32 %v2661_v27, %v531_v42  ;;  %v646_v29 = vmul.f32 %v645_v50, %v530_v43  ;;  %v2333_v63 = vmul.f32 %v782_v6, %v2018_v48  ;;  %v830_v2 = vstv %s2292_s15  ;;  %v710_v50 = vpop.permute.xlu0 %709  ;;  %s2689_s15 = sld [smem:[#allocation34_spill]] }
  0xf9   : > { %v535_v26 = vadd.f32 %v534_v52, %v483_v37  ;;  %v539_v25 = vadd.f32 %v538_v53, %v494_v39  ;;  %v834_v30 = vstv %s2298_s10  ;;  %v2662_v54 = vmov %v2661_v27 }
  0xfa   : > { %v657_v35 = vmul.f32 %v2662_v54, %v530_v43  ;;  %v927_v59 = vstv %s2304_s12  ;;  %v570_v0 = vsel %vm374_vm2, %v568_v41, %v569_v5  ;;  %v581_v36 = vsel %vm374_vm2, %v579_v24, %v580_v40 }
  0xfb   : > { %v550_v31 = vadd.f32 %v548_v49, %v535_v26  ;;  %v561_v34 = vadd.f32 %v559_v8, %v539_v25  ;;  %v938_v38 = vstv %s2306_s5  ;;  %v949_v48 = vstv %s2312_s8  ;;  %s2514_s5 = scalar_lea.sflag [#allocation4], %s246_s1 }
  0xfc   : > { %v651_v18 = vrot.slane %v647_v19, 1  ;;  %v662_v62 = vrot.slane %v658_v28, 1  ;;  %v2663_v60 = vstv %s2657_s27  ;;  %v2664_v3 = vstv %s2658_s30  ;;  %s1158_s27 = sshll.u32 %s248_s4, 4  ;;  %s1464_s30 = sshll.u32 %s2686_s14, 2  ;;  %s2505_s27 = int_to_ptr.vmem [resolvable:$true] %s1158_s27 }
  0xfd   : > { %v572_v6 = vadd.f32 %v570_v0, %v550_v31  ;;  %v583_v1 = vadd.f32 %v581_v36, %v561_v34  ;;  %v669_v20 = vmul.f32 %v2663_v60, %v531_v42  ;;  %v680_v4 = vmul.f32 %v2664_v3, %v531_v42  ;;  %s1632_s8 = scalar_lea.vmem %s2505_s27, 256  ;;  %p2691_p1 = scmp.ne.s32.totalorder %s2688_s25, 0 }
  0xfe   : > { %v650_v58 = vrot.slane %v646_v29, 1  ;;  %v716_v32 = vsel %vm325_vm3, 0.0, %v712_v61  ;;  %v661_v33 = vrot.slane %v657_v35, 1  ;;  %v715_v52 = vsel %vm325_vm3, 0.0, %v710_v50  ;;  %s2690_s10 = smov %s2689_s15  ;;  %p1633_p0 = scmp.ne.s32.totalorder %s2505_s27, %s1632_s8 }
  0xff   : > { %v587_v11 = vadd.f32 %v2223_v56, %v572_v6  ;;  %v591_v15 = vadd.f32 %v2226_v57, %v583_v1  ;;  %v2665_v53 = vstv %s2165_s17  ;;  %v2666_v21 = vstv %s2659_s13  ;;  %s2372_s17 = sld [smem:[#allocation6 + $0x1b]]  ;;  %v720_v1 = vpop.permute.xlu1 %719 }
 0x100   : > { %v638_v16 = vmul.f32 %v2665_v53, %v530_v43  ;;  %v642_v5 = vmul.f32 %v2666_v21, %v530_v43  ;;  %v2667_v37 = vmov %v2663_v60  ;;  %v2668_v40 = vmov %v2664_v3  ;;  %p1634_p2 = pnand %p1633_p0, %p2691_p1 }
 0x101   : > { %v668_v39 = vmul.f32 %v2667_v37, %v530_v43  ;;  %v679_v42 = vmul.f32 %v2668_v40, %v530_v43  ;;  %v602_v49 = vadd.f32 %v2041_v9, %v587_v11  ;;  %v613_v8 = vadd.f32 %v2046_v12, %v591_v15 }
 0x102   : > { %v2669_v41 = vstv %s2169_s21  ;;  %v2670_v24 = vstv %s2171_s22  ;;  %v673_v26 = vrot.slane %v669_v20, 2  ;;  %v684_v25 = vrot.slane %v680_v4, 2  ;;  %s2384_s21 = sld [smem:[#allocation6 + $0x20]]  ;;  %p1635_p5 = pneg %p1634_p2 }
 0x103   : > { %v736_v56 = vmul.f32 %v2669_v41, %v716_v32  ;;  %v747_v57 = vmul.f32 %v2670_v24, %v716_v32  ;;  %v2671_v19 = vmov %v2669_v41  ;;  %v2672_v28 = vmov %v2670_v24  ;;  %s2386_s22 = sld [smem:[#allocation6 + $0x44]] }
 0x104   : > { %v735_v27 = vmul.f32 %v2671_v19, %v715_v52  ;;  %v746_v29 = vmul.f32 %v2672_v28, %v715_v52  ;;  %v624_v9 = vadd.f32 %v2069_v22, %v602_v49  ;;  %v635_v12 = vadd.f32 %v2072_v23, %v613_v8 }
 0x105   : > { %v652_v43 = vsel %vm351_vm1, %v650_v58, %v651_v18  ;;  %v663_v31 = vsel %vm351_vm1, %v661_v33, %v662_v62  ;;  %v672_v34 = vrot.slane %v668_v39, 2  ;;  %v683_v54 = vrot.slane %v679_v42, 2  ;;  %v718_v58 = vpop.permute.xlu0 %717 }
 0x106   : > { %v2673_v35 = vstv %s2173_s16  ;;  %v2674_v0 = vstv %s2660_s11  ;;  %v639_v22 = vadd.f32 %v638_v16, %v624_v9  ;;  %v643_v23 = vadd.f32 %v642_v5, %v635_v12  ;;  %s2452_s16 = sld [smem:[#allocation6 + $0x23]] }
 0x107   : > { %v758_v61 = vmul.f32 %v2673_v35, %v716_v32  ;;  %v769_v36 = vmul.f32 %v2674_v0, %v716_v32  ;;  %v740_v50 = vrot.slane %v736_v56, 1  ;;  %v751_v6 = vrot.slane %v747_v57, 1 }
 0x108   : > { %v739_v18 = vrot.slane %v735_v27, 1  ;;  %v750_v62 = vrot.slane %v746_v29, 1  ;;  %v2675_v60 = vmov %v2673_v35  ;;  %v2676_v3 = vmov %v2674_v0  ;;  %v905_v0 = vpop.permute.xlu1 %904 }
 0x109   : > { %v757_v20 = vmul.f32 %v2675_v60, %v715_v52  ;;  %v768_v4 = vmul.f32 %v2676_v3, %v715_v52  ;;  %v654_v32 = vadd.f32 %v652_v43, %v639_v22  ;;  %v665_v11 = vadd.f32 %v663_v31, %v643_v23 }
 0x10a   : > { %v2677_v15 = vstv %s2177_s3  ;;  %v2678_v53 = vstv %s2180_s23  ;;  %v762_v21 = vrot.slane %v758_v61, 2  ;;  %v674_v5 = vsel %vm374_vm2, %v672_v34, %v673_v26  ;;  %s2436_s3 = sld [smem:[#allocation6 + $0x40]] }
 0x10b   : > { %v727_v33 = vmul.f32 %v2677_v15, %v715_v52  ;;  %v731_v16 = vmul.f32 %v2678_v53, %v715_v52  ;;  %v685_v37 = vsel %vm374_vm2, %v683_v54, %v684_v25  ;;  %v724_v39 = vsel %vm334_vm4, %v720_v1, 0.0  ;;  %s2460_s23 = sld [smem:[#allocation6 + $0x1d]] }
 0x10c   : > { %v773_v40 = vrot.slane %v769_v36, 2  ;;  %v676_v42 = vadd.f32 %v674_v5, %v654_v32  ;;  %v687_v49 = vadd.f32 %v685_v37, %v665_v11  ;;  %v723_v8 = vsel %vm334_vm4, %v718_v58, 0.0 }
 0x10d   : > { %v741_v52 = vsel %vm351_vm1, %v739_v18, %v740_v50  ;;  %v752_v41 = vsel %vm351_vm1, %v750_v62, %v751_v6  ;;  %v761_v56 = vrot.slane %v757_v20, 2  ;;  %v772_v24 = vrot.slane %v768_v4, 2  ;;  %v903_v50 = vpop.permute.xlu0 %902 }
 0x10e   : > { %v728_v57 = vadd.f32 %v727_v33, %v676_v42  ;;  %v732_v26 = vadd.f32 %v731_v16, %v687_v49  ;;  %v2679_v25 = vstv %s2183_s6  ;;  %v2680_v27 = vstv %s2188_s20  ;;  %s2456_s20 = sld [smem:[#allocation6 + $0x47]] }
 0x10f   : > { %v840_v19 = vmul.f32 %v2679_v25, %v724_v39  ;;  %v851_v28 = vmul.f32 %v2680_v27, %v724_v39  ;;  %v2681_v29 = vmov %v2679_v25  ;;  %v960_v12 = vstv %s2366_s0  ;;  %s2464_s6 = sld [smem:[#allocation6 + $0x41]]  ;;  %s1764_s0 = smov [#allocation7]  }
 0x110   : > { %v839_v9 = vmul.f32 %v2681_v29, %v723_v8  ;;  %v919_v43 = vstv %s2372_s17  ;;  %v923_v31 = vstv %s2378_s24  ;;  %v743_v34 = vadd.f32 %v741_v52, %v728_v57  ;;  %v913_v29 = vpop.permute.xlu1 %912  ;;  %s1636_s17 = sshll.u32 %s1764_s0, 4  ;;  %s1637_s17 = int_to_ptr.vmem [resolvable:$false] %s1636_s17 }
 0x111   : > { %v754_v54 = vadd.f32 %v752_v41, %v732_v26  ;;  %v2682_v35 = vmov %v2680_v27  ;;  %v1031_v36 = vstv %s2384_s21  ;;  %v763_v22 = vsel %vm374_vm2, %v761_v56, %v762_v21  ;;  %s1638_s24 = scalar_lea.vmem %s1637_s17, 512  ;;  %p1639_p8 = scmp.lt.s32.totalorder %s2505_s27, %s1637_s17 }
 0x112   : > { %v850_v61 = vmul.f32 %v2682_v35, %v723_v8  ;;  %v774_v23 = vsel %vm374_vm2, %v772_v24, %v773_v40  ;;  %v1042_v6 = vstv %s2386_s22  ;;  %v971_v1 = vstv %s2392_s18  ;;  %p1640_p9 = scmp.lt.s32.totalorder %s1638_s24, %s1632_s8 }
 0x113   : > { %v765_v18 = vadd.f32 %v763_v22, %v743_v34  ;;  %v776_v62 = vadd.f32 %v774_v23, %v754_v54  ;;  %v844_v60 = vrot.slane %v840_v19, 1  ;;  %v855_v20 = vrot.slane %v851_v28, 1  ;;  %v911_v23 = vpop.permute.xlu0 %910 }
 0x114   : > { %v2683_v3 = vstv %s2196_s7  ;;  %v873_v58 = vmul.f32 %v871_v51, %v724_v39  ;;  %v843_v32 = vrot.slane %v839_v9, 1  ;;  %v909_v11 = vsel %vm325_vm3, 0.0, %v905_v0  ;;  %s2687_s7 = sld [smem:[#allocation16_spill]]  ;;  %p1641_p11 = por %p1640_p9, %p1639_p8 }
 0x115   : > { %v862_v4 = vmul.f32 %v2683_v3, %v724_v39  ;;  %v780_v15 = vadd.f32 %v2263_v55, %v765_v18  ;;  %v784_v33 = vadd.f32 %v2333_v63, %v776_v62  ;;  %v854_v53 = vrot.slane %v850_v61, 1 }
 0x116   : > { %v908_v16 = vsel %vm325_vm3, 0.0, %v903_v50  ;;  %v831_v21 = vmul.f32 %v830_v2, %v723_v8  ;;  %v835_v5 = vmul.f32 %v834_v30, %v723_v8  ;;  %v2684_v37 = vmov %v2683_v3  ;;  %p1642_p13 = pnand %p1641_p11, %p1635_p5 }
 0x117   : > { %v861_v40 = vmul.f32 %v2684_v37, %v723_v8  ;;  %v872_v39 = vmul.f32 %v871_v51, %v723_v8  ;;  %v795_v42 = vadd.f32 %v2086_v44, %v780_v15  ;;  %v806_v55 = vadd.f32 %v2089_v45, %v784_v33 }
 0x118   : > { %v929_v63 = vmul.f32 %v927_v59, %v909_v11  ;;  %v940_v49 = vmul.f32 %v938_v38, %v909_v11  ;;  %v866_v52 = vrot.slane %v862_v4, 2  ;;  %v877_v41 = vrot.slane %v873_v58, 2 }
 0x119   : > { %v928_v2 = vmul.f32 %v927_v59, %v908_v16  ;;  %v939_v30 = vmul.f32 %v938_v38, %v908_v16  ;;  %v817_v56 = vadd.f32 %v2092_v46, %v795_v42  ;;  %v828_v51 = vadd.f32 %v2095_v47, %v806_v55 }
 0x11a   : > { %v845_v8 = vsel %vm351_vm1, %v843_v32, %v844_v60  ;;  %v856_v44 = vsel %vm351_vm1, %v854_v53, %v855_v20  ;;  %v865_v45 = vrot.slane %v861_v40, 2  ;;  %v876_v24 = vrot.slane %v872_v39, 2  ;;  %s1155_s13 = sadd.s32 %s2687_s7, %s1464_s30 }
 0x11b   : > { %v951_v57 = vmul.f32 %v949_v48, %v909_v11  ;;  %v962_v26 = vmul.f32 %v960_v12, %v909_v11  ;;  %v832_v59 = vadd.f32 %v831_v21, %v817_v56  ;;  %v836_v38 = vadd.f32 %v835_v5, %v828_v51  ;;  %s1465_s11 = sshll.u32 %s1155_s13, 7 }
 0x11c   : > { %v933_v25 = vrot.slane %v929_v63, 1  ;;  %v944_v46 = vrot.slane %v940_v49, 1  ;;  %v932_v19 = vrot.slane %v928_v2, 1  ;;  %v943_v47 = vrot.slane %v939_v30, 1  ;;  %s2510_s12 = scalar_lea.hbm %s2689_s15, %s1465_s11 }
 0x11d   : > { %v950_v27 = vmul.f32 %v949_v48, %v908_v16  ;;  %v961_v28 = vmul.f32 %v960_v12, %v908_v16  ;;  %v847_v9 = vadd.f32 %v845_v8, %v832_v59  ;;  %v858_v34 = vadd.f32 %v856_v44, %v836_v38 }
 0x11e   : > { %v920_v54 = vmul.f32 %v919_v43, %v908_v16  ;;  %v924_v35 = vmul.f32 %v923_v31, %v908_v16  ;;  %v955_v61 = vrot.slane %v951_v57, 2  ;;  %v867_v0 = vsel %vm374_vm2, %v865_v45, %v866_v52 }
 0x11f   : > { %v878_v22 = vsel %vm374_vm2, %v876_v24, %v877_v41  ;;  %v975_v48 = vstv %s2436_s3  ;;  %v966_v12 = vrot.slane %v962_v26, 2  ;;  %v869_v50 = vadd.f32 %v867_v0, %v847_v9 }
 0x120   : > { %v880_v43 = vadd.f32 %v878_v22, %v858_v34  ;;  %v917_v31 = vsel %vm334_vm4, %v913_v29, 0.0  ;;  %v934_v18 = vsel %vm351_vm1, %v932_v19, %v933_v25  ;;  %v945_v62 = vsel %vm351_vm1, %v943_v47, %v944_v46 }
 0x121   : > { %v954_v60 = vrot.slane %v950_v27, 2  ;;  %v965_v20 = vrot.slane %v961_v28, 2  ;;  %v921_v3 = vadd.f32 %v920_v54, %v869_v50  ;;  %v916_v58 = vsel %vm334_vm4, %v911_v23, 0.0 }
 0x122   : > { %v925_v4 = vadd.f32 %v924_v35, %v880_v43  ;;  %v1053_v32 = vstv %s2452_s16  ;;  %v1064_v11 = vstv %s2456_s20  ;;  %v1033_v15 = vmul.f32 %v1031_v36, %v917_v31 }
 0x123   : > { %v1044_v33 = vmul.f32 %v1042_v6, %v917_v31  ;;  %v936_v53 = vadd.f32 %v934_v18, %v921_v3  ;;  %v972_v21 = vmul.f32 %v971_v1, %v2060_v17  ;;  %v976_v5 = vmul.f32 %v975_v48, %v2060_v17 }
 0x124   : > { %v947_v16 = vadd.f32 %v945_v62, %v925_v4  ;;  %v956_v37 = vsel %vm374_vm2, %v954_v60, %v955_v61  ;;  %v967_v40 = vsel %vm374_vm2, %v965_v20, %v966_v12  ;;  %v1032_v39 = vmul.f32 %v1031_v36, %v916_v58 }
 0x125   : > { %v1043_v42 = vmul.f32 %v1042_v6, %v916_v58  ;;  %v958_v55 = vadd.f32 %v956_v37, %v936_v53  ;;  %v1037_v49 = vrot.slane %v1033_v15, 1  ;;  %v1048_v52 = vrot.slane %v1044_v33, 1 }
 0x126   : > { %v969_v63 = vadd.f32 %v967_v40, %v947_v16  ;;  %v1023_v41 = vstv %s2460_s23  ;;  %v1027_v2 = vstv %s2464_s6  ;;  %v1055_v30 = vmul.f32 %v1053_v32, %v917_v31 }
 0x127   : > { %v1066_v56 = vmul.f32 %v1064_v11, %v917_v31  ;;  %v973_v51 = vadd.f32 %v972_v21, %v958_v55  ;;  %v1036_v1 = vrot.slane %v1032_v39, 1  ;;  %v1047_v8 = vrot.slane %v1043_v42, 1 }
 0x128   : > { %v977_v17 = vadd.f32 %v976_v5, %v969_v63  ;;  %v1054_v44 = vmul.f32 %v1053_v32, %v916_v58  ;;  %v1065_v45 = vmul.f32 %v1064_v11, %v916_v58  ;;  %v1024_v36 = vmul.f32 %v1023_v41, %v916_v58 }
 0x129   : > { %v1028_v6 = vmul.f32 %v1027_v2, %v916_v58  ;;  %v988_v24 = vadd.f32 %v2102_v7, %v973_v51  ;;  %v1059_v26 = vrot.slane %v1055_v30, 2  ;;  %v1070_v59 = vrot.slane %v1066_v56, 2 }
 0x12a   : > { %v999_v57 = vadd.f32 %v2105_v10, %v977_v17  ;;  %v1058_v46 = vrot.slane %v1054_v44, 2  ;;  %v1069_v19 = vrot.slane %v1065_v45, 2  ;;  %v1038_v47 = vsel %vm351_vm1, %v1036_v1, %v1037_v49 }
 0x12b   : > { %v1010_v38 = vadd.f32 %v2108_v13, %v988_v24  ;;  %v1049_v27 = vsel %vm351_vm1, %v1047_v8, %v1048_v52  ;;  %v1075_v34 = vstv %s2489_s26  ;;  %v1099_v54 = vstv %s1461_s28 }
 0x12c   : > { %v1021_v25 = vadd.f32 %v2111_v14, %v999_v57  ;;  %v1060_v10 = vsel %vm374_vm2, %v1058_v46, %v1059_v26  ;;  %v1071_v13 = vsel %vm374_vm2, %v1069_v19, %v1070_v59 }
 0x12d   : > { %v1025_v28 = vadd.f32 %v1024_v36, %v1010_v38 }
 0x12e   : > { %v1029_v29 = vadd.f32 %v1028_v6, %v1021_v25 }
 0x12f   : > { %v1040_v9 = vadd.f32 %v1038_v47, %v1025_v28 }
 0x130   : > { %v1051_v7 = vadd.f32 %v1049_v27, %v1029_v29 }
 0x131   : > { %v1062_v14 = vadd.f32 %v1060_v10, %v1040_v9 }
 0x132   : > { %v1073_v35 = vadd.f32 %v1071_v13, %v1051_v7 }
 0x133   : > { %v1076_v61 = vadd.f32 %v1075_v34, %v1062_v14 }
 0x134   : > { %v1100_v0 = vadd.f32 %v1099_v54, %v1073_v35 }
 0x135   : > { %v1079_v22 = vsel %vm1077_vm5, %v1076_v61, 0.0  ;;  %1078 = vst.msk [vmem:[%s248_s4] sm:$0xff] %vm1077_vm5, %v1076_v61  ;;  %v1088_v23 = vmul.f32 %v1076_v61, %v1076_v61 }
 0x136   : > { %1462 = vst.msk [vmem:[%s248_s4 + $0x8] sm:$0xff] %vm1077_vm5, %v1100_v0  ;;  %1080 = vadd.xlane.f32.xlu0 %v1079_v22  ;;  %v1103_v12 = vsel %vm1077_vm5, %v1100_v0, 0.0  ;;  %v1112_v50 = vmul.f32 %v1100_v0, %v1100_v0 }
 0x137   : > { %v1089_v48 = vsel %vm1077_vm5, %v1088_v23, 0.0 }
 0x138   : > { %1090 = vadd.xlane.f32.xlu1 %v1089_v48  ;;  %v1113_v43 = vsel %vm1077_vm5, %v1112_v50, 0.0 }
 0x13a   : > { %1104 = vadd.xlane.f32.xlu0 %v1103_v12 }
 0x13e   : > { %1114 = vadd.xlane.f32.xlu0 %v1113_v43 }
 0x13f   : > { %1645 = shalt.err (!%p1642_p13)
}
 0x140   : > { %s1646_s21 = scalar_lea.hbm %s2510_s12, 256  ;;  %s1650_s3 = scalar_lea.hbm %s2690_s10, 1024 }
 0x141   : > { %p1647_p4 = scmp.ne.s32.totalorder %s2510_s12, %s1646_s21  ;;  %p1651_p10 = scmp.lt.s32.totalorder %s2510_s12, %s2690_s10 }
 0x142   : > { %p1652_p3 = scmp.lt.s32.totalorder %s1650_s3, %s1646_s21 }
 0x143   : > { %p1648_p6 = pnand %p1647_p4, %p2691_p1 }
 0x144   : > { %p1653_p12 = por %p1652_p3, %p1651_p10 }
 0x145   : > { %p1649_p7 = pneg %p1648_p6 }
 0x147   : > { %p1654_p0 = pnand %p1653_p12, %p1649_p7 }
 0x149   : > { %1657 = shalt.err (!%p1654_p0)
}
 0x14a   : > { %s1765_s23 = smov 128   ;;  %s1766_s6 = smov 256   ;;  %vm1123_vm6 = vcmask 1024  }
 0x14b   : > { %s1767_s26 = smov 8   ;;  %p269_p2 = scmp.lt.s32.totalorder %s2686_s14, 1 }
 0x14c   : > { %1475 = dma.vmem_to_hbm [thread:$0]  (%p2691_p1), %s2505_s27, 256, %s2510_s12, %s2514_s5, %s1765_s23, %s1766_s6, %s1767_s26  }
 0x14d   : > { %p271_p5 = scmp.lt.s32.totalorder %s2687_s7, 1  ;;  %s2719_s14 = smov (!%p269_p2, %s2686_s14), 1 }
 0x14e   : > { %s1371_s29 = sshll.u32 %s2719_s14, 1  ;;  %s2692_s14 = sld [smem:[#allocation35_spill]] }
 0x14f   : > { %s2721_s7 = smov (!%p271_p5, %s2687_s7), 1  ;;  %s2693_s30 = sld [smem:[#allocation36_spill]] }
 0x150   : > { %s274_s28 = sadd.s32 %s1371_s29, %s2721_s7 }
 0x151   : > { %s1372_s1 = sshll.u32 %s274_s28, 1 }
 0x154   : > { %s276_s25 = scalar_lea.vmem %s2692_s14, %s1372_s1 }
 0x155   : > { %s284_s13 = scalar_lea.vmem %s2693_s30, %s1372_s1 }
 0x1bf   : > { %v1081_v31 = vpop.xlane.xlu0 %1080 }
 0x1c0   : > { %v1082_v18 = vrot.slane %v1081_v31, 4 }
 0x1c1   : > { %v1091_v62 = vpop.xlane.xlu1 %1090 }
 0x1c2   : > { %v1083_v60 = vadd.f32 %v1082_v18, %v1081_v31  ;;  %v1092_v20 = vrot.slane %v1091_v62, 4 }
 0x1c3   : > { %v1105_v3 = vpop.xlane.xlu0 %1104 }
 0x1c4   : > { %v1084_v4 = vrot.slane %v1083_v60, 2  ;;  %v1093_v58 = vadd.f32 %v1092_v20, %v1091_v62  ;;  %v1106_v32 = vrot.slane %v1105_v3, 4 }
 0x1c6   : > { %v1085_v11 = vadd.f32 %v1084_v4, %v1083_v60  ;;  %v1094_v15 = vrot.slane %v1093_v58, 2  ;;  %v1107_v33 = vadd.f32 %v1106_v32, %v1105_v3 }
 0x1c7   : > { %v1115_v53 = vpop.xlane.xlu0 %1114 }
 0x1c8   : > { %v1108_v16 = vrot.slane %v1107_v33, 2  ;;  %v1116_v21 = vrot.slane %v1115_v53, 4  ;;  %v1086_v5 = vrot.slane %v1085_v11, 1  ;;  %v1095_v37 = vadd.f32 %v1094_v15, %v1093_v58 }
 0x1ca   : > { %v1109_v40 = vadd.f32 %v1108_v16, %v1107_v33  ;;  %v1117_v39 = vadd.f32 %v1116_v21, %v1115_v53  ;;  %v1087_v63 = vadd.f32 %v1086_v5, %v1085_v11  ;;  %v1096_v49 = vrot.slane %v1095_v37, 1 }
 0x1cc   : > { %v1110_v42 = vrot.slane %v1109_v40, 1  ;;  %v1118_v55 = vrot.slane %v1117_v39, 2  ;;  %v1097_v56 = vadd.f32 %v1096_v49, %v1095_v37 }
 0x1ce   : > { %v1111_v52 = vadd.f32 %v1110_v42, %v1109_v40  ;;  %v1119_v41 = vadd.f32 %v1118_v55, %v1117_v39 }
 0x1d0   : > { %v1122_v2 = vsel %vm314_vm0, %v1087_v63, %v1111_v52  ;;  %v1120_v30 = vrot.slane %v1119_v41, 1 }
 0x1d1   : > { %1124 = vst.msk [vmem:[%s276_s25] sm:$0x3] %vm1123_vm6, %v1122_v2 }
 0x1d2   : > { %v1121_v51 = vadd.f32 %v1120_v30, %v1119_v41 }
 0x1d4   : > { %v1125_v17 = vsel %vm314_vm0, %v1097_v56, %v1121_v51 }
 0x1d5   : > { %1126 = vst.msk [vmem:[%s284_s13] sm:$0x3] %vm1123_vm6, %v1125_v17 }
 0x1d6 PF: > { %s2694_s11 = sld [smem:[#allocation20_spill]] }
 0x1d7   : > { %s2695_s2 = sld [smem:[#allocation11_spill]] }
 0x1d8   : > { %s2696_s19 = sld [smem:[#allocation22_spill]] }
 0x1dc   : > { %p1492_p1 = scmp.ge.s32.totalorder %s2694_s11, 2 }
 0x1dd   : > { %s1179_s15 = sand.u32 1, %s2695_s2  }
 0x1de   : > { %p2697_p8 = scmp.ne.s32.totalorder %s2696_s19, 0  ;;  %s1180_s12 = scalar_lea.sflag [#allocation4], %s1179_s15 }
 0x1e0   : > { %p1486_p9 = pnand %p1492_p1, %p2697_p8 }
 0x1e2   : > { %p1487_p11 = pneg %p1486_p9 }
 0x1e4   : > { %1711 = dma.done.wait (%p1487_p11), %s1180_s12, 256  }
 0x1e5   : > { %1713 = vsyncadd (%p1487_p11), %s1180_s12, 4294967040  ;;  %s22_s25 = sadd.s32 1, %s2694_s11   ;;  %s2698_s15 = sld [smem:[#allocation12_spill]] }
 0x1e6   : > { %p19_p13 = scmp.ge.s32.totalorder %s22_s25, 6   ;;  %s2699_s16 = sld [smem:[#allocation13_spill]] }
 0x1e7   : > { %s2700_s17 = sld [smem:[#allocation26_spill]] }
 0x1e8   : > { %s2701_s18 = sld [smem:[#allocation14_spill]] }
 0x1e9   : > { %s2702_s19 = sld [smem:[#allocation15_spill]] }
 0x1ea   : > { %s2703_s20 = sld [smem:[#allocation25_spill]]  ;;  %21 = sbr.rel (!%p19_p13) target bundleno = 16 (0x10), region = 115 }
 0x1eb   : > { %s2704_s21 = sld [smem:[#allocation18_spill]] }
 0x1ec   : > { %s2705_s22 = sld [smem:[#allocation19_spill]] }
 0x1ed   : > { %s2706_s23 = sld [smem:[#allocation23_spill]] }
 0x1ee   : > { %s2707_s24 = sld [smem:[#allocation24_spill]] }
 0x1ef   :  { %1207 = vsyncpa [#allocation3], 1 }
 0x1f0   :  { %1209 = vsyncpa [#allocation3 + $0x1], 1 }
 0x1f1   :  { %1210 = vsyncpa [#allocation4], 1 }
 0x1f2   :  { %1212 = vsyncpa [#allocation4 + $0x1], 1 }
 0x1f3   :  { %1213 = vsyncpa [#allocation5], 1 }
 0x1f4   :  { %1215 = vsyncpa [#allocation5 + $0x1], 1 }

</bundles_post_ra>
